<compile_context>
chip_gen: v7x
topology: tpu7x:2x2x1
jax: 0.10.0
libtpu: 0.0.40
codegen_flags: <defaults>
</compile_context>

<pallas_src>
import functools

import jax
import jax.numpy as jnp
from jax import lax
from jax.experimental import pallas as pl
from jax.experimental.pallas import tpu as pltpu

HP = jax.lax.Precision.HIGHEST
_LANES = 128
_CHUNK = 8          # sublane rows processed per inner-loop step (1 vreg/value)


# ----------------------------------------------------------------------------
# Pallas kernel: one grid step = one tile of (bs * 128) points, all cameras
# ----------------------------------------------------------------------------
def _tri_kernel(uv_ref, uvo_ref, relR_ref, relt_ref, reltR_ref,
                RtR_ref, Rtt_ref, fc_ref, me2_ref,
                kpts_ref, depth_ref, dis_ref):
    fx = fc_ref[0]
    fy = fc_ref[1]
    cx = fc_ref[2]
    cy = fc_ref[3]
    ifx = fc_ref[4]
    ify = fc_ref[5]
    nine_fx = fc_ref[6]
    nine_fy = fc_ref[7]
    me2 = me2_ref[0]

    n_cams = uvo_ref.shape[0]
    bs = uv_ref.shape[1]
    n_chunks = bs // _CHUNK

    # Hoist ALL loop-invariant SMEM scalar reads out of the chunk loop
    # (scalar slot is 2/bundle; keeping them inside would add ~60 sld per
    # iteration and grow further with unrolling).
    cam = []
    for c in range(n_cams):
        R = tuple(relR_ref[9 * c + k] for k in range(9))
        t = tuple(relt_ref[3 * c + k] for k in range(3))
        w = tuple(reltR_ref[3 * c + k] for k in range(3))   # t @ R, precomputed
        cam.append((R, t, w))
    RtR = tuple(RtR_ref[k] for k in range(9))
    Rtt = tuple(Rtt_ref[k] for k in range(3))

    def chunk_body(j, carry):
        s = pl.multiple_of(j * _CHUNK, _CHUNK)
        rows = pl.ds(s, _CHUNK)

        u = uv_ref[0, rows, :]
        v = uv_ref[1, rows, :]

        # unit reference ray (normalization of d1 is required: `dis` depends
        # on the true scale of d1) -- computed once per chunk, reused per cam
        d1x = (u - cx) * ifx
        d1y = (v - cy) * ify
        inv1 = jax.lax.rsqrt(d1x * d1x + d1y * d1y + 1.0)
        d1z = inv1
        d1x = d1x * inv1
        d1y = d1y * inv1

        kx = jnp.zeros_like(u)
        ky = jnp.zeros_like(u)
        kz = jnp.zeros_like(u)
        best2 = jnp.zeros_like(u)          # best disambiguation, SQUARED

        for c in range(n_cams):            # tiny static camera count
            (r00, r01, r02, r10, r11, r12, r20, r21, r22), \
                (t0, t1, t2), (w0, w1, w2) = cam[c]

            uo = uvo_ref[c, 0, rows, :]
            vo = uvo_ref[c, 1, rows, :]

            # matched ray rotated into the reference frame: d2 = R @ e.
            # Left UN-normalized: dist/xyz are exactly scale-invariant in d2
            # and nothing else uses |d2|.
            ex = (uo - cx) * ifx
            ey = (vo - cy) * ify
            d2x = r00 * ex + r01 * ey + r02
            d2y = r10 * ex + r11 * ey + r12
            d2z = r20 * ex + r21 * ey + r22

            # n = d1 x d2 ; n2 = d2 x n
            nx = d1y * d2z - d1z * d2y
            ny = d1z * d2x - d1x * d2z
            nz = d1x * d2y - d1y * d2x
            n2x = d2y * nz - d2z * ny
            n2y = d2z * nx - d2x * nz
            n2z = d2x * ny - d2y * nx

            num = n2x * t0 + n2y * t1 + n2z * t2
            den = n2x * d1x + n2y * d1y + n2z * d1z
            rden = pl.reciprocal(den, approx=True)     # EUP
            rden = rden * (2.0 - den * rden)           # one Newton refinement
            dist = num * rden

            xx = d1x * dist
            xy = d1y * dist
            xz = d1z * dist

            # single rotation rd = d1 @ R ; the projected points are
            # (a*d1 - t) @ R = a*rd - t@R  with a in {1, 10, dist}
            rdx = d1x * r00 + d1y * r10 + d1z * r20
            rdy = d1x * r01 + d1y * r11 + d1z * r21
            rdz = d1x * r02 + d1y * r12 + d1z * r22

            # fused disambiguation (u1-u2, v1-v2): cx/cy cancel, shared denom
            pden = (rdz - w2) * (10.0 * rdz - w2)
            ipden = pl.reciprocal(pden, approx=True)   # EUP
            du = nine_fx * (rdx * w2 - w0 * rdz) * ipden
            dv = nine_fy * (rdy * w2 - w1 * rdz) * ipden
            dis2 = du * du + dv * dv                   # squared disambiguation

            # expected reprojection of the triangulated point
            pz = dist * rdz - w2
            iz = pl.reciprocal(pz, approx=True)        # EUP
            eu = (dist * rdx - w0) * iz * fx + cx
            ev = (dist * rdy - w1) * iz * fy + cy
            e0 = eu - uo
            e1 = ev - vo
            err2 = e0 * e0 + e1 * e1                   # squared reproj. error

            valid = ((xz > 1e-6) & (dis2 > best2) & (err2 < me2)
                     & (jnp.minimum(uo, vo) > 0.0))

            kx = jnp.where(valid, xx, kx)
            ky = jnp.where(valid, xy, ky)
            kz = jnp.where(valid, xz, kz)
            best2 = jnp.where(valid, dis2, best2)

        # world frame: kpts3d = (kpts3d - Rt[:3,3]) @ Rt[:3,:3]
        bx = kx - Rtt[0]
        by = ky - Rtt[1]
        bz = kz - Rtt[2]
        kpts_ref[0, rows, :] = bx * RtR[0] + by * RtR[3] + bz * RtR[6]
        kpts_ref[1, rows, :] = bx * RtR[1] + by * RtR[4] + bz * RtR[7]
        kpts_ref[2, rows, :] = bx * RtR[2] + by * RtR[5] + bz * RtR[8]
        depth_ref[rows, :] = kz
        dis_ref[rows, :] = jnp.sqrt(best2)     # single sqrt per point
        return carry

    lax.fori_loop(0, n_chunks, chunk_body, 0, unroll=min(2, n_chunks))


# ----------------------------------------------------------------------------
# Wrapper (glue: pose inversion, relative poses, layout / padding)
# ----------------------------------------------------------------------------
def _ceil_to(a, b):
    return -(-a // b) * b


def _pick_block_rows(rows, block_rows):
    # Aim for >=2 grid steps (v7x has 2 TensorCores) whenever there are at
    # least two 8-sublane chunks of points; never drop below one chunk.
    if rows >= 2 * _CHUNK:
        half = _ceil_to(-(-rows // 2), _CHUNK)
        return min(block_rows, half)
    return _ceil_to(rows, _CHUNK)


@functools.partial(jax.jit, static_argnames=("block_rows",))
def triangulate_pallas(uv, uvs_others, Rt, Rts_others, f, centre,
                       max_error, min_dis, block_rows=128):
    n_pts = uv.shape[0]
    n_cams = uvs_others.shape[0]

    # --- tiny 4x4 pose algebra in plain JAX (negligible work) ---------------
    Rts_inv = jnp.linalg.inv(Rts_others)
    rel = jnp.einsum("ij,cjk->cik", Rt, Rts_inv, precision=HP)    # (n_cams,4,4)
    relR_m = rel[:, :3, :3].astype(jnp.float32)                   # (n_cams,3,3)
    relt_m = rel[:, :3, 3].astype(jnp.float32)                    # (n_cams,3)
    reltR_m = jnp.einsum("ci,cij->cj", relt_m, relR_m, precision=HP)  # t @ R
    relR = relR_m.reshape(n_cams * 9)
    relt = relt_m.reshape(n_cams * 3)
    reltR = reltR_m.reshape(n_cams * 3)
    RtR = Rt[:3, :3].astype(jnp.float32).reshape(9)
    Rtt = Rt[:3, 3].astype(jnp.float32)
    f_arr = jnp.broadcast_to(
        jnp.atleast_1d(jnp.asarray(f, jnp.float32)).reshape(-1), (2,))
    c_arr = jnp.asarray(centre, jnp.float32).reshape(2)
    # fx, fy, cx, cy, 1/fx, 1/fy, 9*fx, 9*fy
    fc = jnp.concatenate([f_arr, c_arr, 1.0 / f_arr, 9.0 * f_arr])
    me2 = (jnp.asarray(max_error, jnp.float32) ** 2).reshape(1)

    # --- point layout: pad N, put points on (sublane, lane) = (rows, 128) ---
    rows = max(1, -(-n_pts // _LANES))
    bs = _pick_block_rows(rows, block_rows)             # multiple of 8
    rows_p = _ceil_to(rows, bs)
    n_pad = rows_p * _LANES

    uv_p = jnp.zeros((n_pad, 2), jnp.float32).at[:n_pts].set(
        uv.astype(jnp.float32))
    # sentinel matches (-1) make padded points fail the min(uo,vo) > 0 test
    uvo_p = jnp.full((n_cams, n_pad, 2), -1.0, jnp.float32).at[:, :n_pts].set(
        uvs_others.astype(jnp.float32))

    uv_l = uv_p.T.reshape(2, rows_p, _LANES)
    uvo_l = jnp.transpose(uvo_p, (0, 2, 1)).reshape(n_cams, 2, rows_p, _LANES)

    smem = pl.BlockSpec(memory_space=pltpu.MemorySpace.SMEM)
    kpts_l, depth_l, dis_l = pl.pallas_call(
        _tri_kernel,
        out_shape=(
            jax.ShapeDtypeStruct((3, rows_p, _LANES), jnp.float32),  # kpts3d
            jax.ShapeDtypeStruct((rows_p, _LANES), jnp.float32),     # depth
            jax.ShapeDtypeStruct((rows_p, _LANES), jnp.float32),     # best dis
        ),
        grid_spec=pltpu.PrefetchScalarGridSpec(
            num_scalar_prefetch=0,
            grid=(rows_p // bs,),
            in_specs=[
                pl.BlockSpec((2, bs, _LANES), lambda i: (0, i, 0)),
                pl.BlockSpec((n_cams, 2, bs, _LANES), lambda i: (0, 0, i, 0)),
                smem, smem, smem, smem, smem, smem, smem,
            ],
            out_specs=(
                pl.BlockSpec((3, bs, _LANES), lambda i: (0, i, 0)),
                pl.BlockSpec((bs, _LANES), lambda i: (i, 0)),
                pl.BlockSpec((bs, _LANES), lambda i: (i, 0)),
            ),
        ),
        compiler_params=pltpu.CompilerParams(
            dimension_semantics=("parallel",)),
    )(uv_l, uvo_l, relR, relt, reltR, RtR, Rtt, fc, me2)

    kpts3d = kpts_l.reshape(3, n_pad).T[:n_pts]
    depth = depth_l.reshape(n_pad)[:n_pts]
    best = dis_l.reshape(n_pad)[:n_pts]
    return kpts3d, depth, best, best > min_dis


# ----------------------------------------------------------------------------
# Pure-JAX reference (mirrors the PyTorch module) for validation
# ----------------------------------------------------------------------------
def _depth2points(uv, depth, f, centre):
    xy = (uv - centre) / f * depth
    z = jnp.full(uv.shape[:-1] + (1,), depth, dtype=uv.dtype)
    return jnp.concatenate([xy, z], axis=-1)


def _pts2px(xyz, f, centre):
    return xyz[..., :2] / xyz[..., 2:3] * f + centre


def _matches_to_points_ref(uv, uvm, R, t, f, centre):
    p2 = t[None]
    d1 = _depth2points(uv, 1.0, f, centre)
    d2 = _depth2points(uvm, 1.0, f, centre)
    d2 = jnp.matmul(d2, R.T, precision=HP)
    d1 = d1 / jnp.linalg.norm(d1, axis=-1, keepdims=True)
    d2 = d2 / jnp.linalg.norm(d2, axis=-1, keepdims=True)
    n = jnp.cross(d1, d2)
    n2 = jnp.cross(d2, n)
    dist = jnp.matmul(n2, p2.T, precision=HP) / jnp.sum(
        n2 * d1, axis=-1, keepdims=True)
    xyz = d1 * dist
    uv1 = _pts2px(jnp.matmul(d1 - p2, R, precision=HP), f, centre)
    uv2 = _pts2px(jnp.matmul(d1 * 10.0 - p2, R, precision=HP), f, centre)
    dis = jnp.linalg.norm(uv1 - uv2, axis=-1)
    exp_uv = _pts2px(jnp.matmul(xyz - p2, R, precision=HP), f, centre)
    err = jnp.linalg.norm(exp_uv - uvm, axis=-1)
    return xyz, dis, err


def triangulate_ref(uv, uvs_others, Rt, Rts_others, f, centre,
                    max_error, min_dis):
    n_pts = uv.shape[0]
    kpts3d = jnp.zeros((n_pts, 3), jnp.float32)
    best = jnp.zeros((n_pts,), jnp.float32)
    Rts_inv = jnp.linalg.inv(Rts_others)
    for ci in range(uvs_others.shape[0]):
        uvo = uvs_others[ci]
        rel = jnp.matmul(Rt, Rts_inv[ci], precision=HP)
        xyz, dis, err = _matches_to_points_ref(uv, uvo, rel[:3, :3],
                                               rel[:3, 3], f, centre)
        valid = ((xyz[:, 2] > 1e-6) & (dis > best) & (err < max_error)
                 & (jnp.min(uvo, axis=-1) > 0))
        kpts3d = jnp.where(valid[:, None], xyz, kpts3d)
        best = jnp.where(valid, dis, best)
    depth = kpts3d[:, 2]
    kpts3d = jnp.matmul(kpts3d - Rt[:3, 3][None], Rt[:3, :3], precision=HP)
    return kpts3d, depth, best, best > min_dis


# ----------------------------------------------------------------------------
if __name__ == "__main__":
    key = jax.random.PRNGKey(0)
    n_pts, n_cams = 256, 3
    f = jnp.array([200.0, 200.0], jnp.float32)
    centre = jnp.array([160.0, 120.0], jnp.float32)
    max_error, min_dis = 2.0, 5.0

    # deterministic, well-conditioned synthetic geometry
    k1, k2 = jax.random.split(key)
    xy = jax.random.uniform(k1, (n_pts, 2), minval=-1.0, maxval=1.0)
    zz = jax.random.uniform(k2, (n_pts, 1), minval=3.0, maxval=6.0)
    pts_w = jnp.concatenate([xy, zz], axis=-1).astype(jnp.float32)

    def rot(rx, ry, rz):
        cxr, sxr = jnp.cos(rx), jnp.sin(rx)
        cyr, syr = jnp.cos(ry), jnp.sin(ry)
        czr, szr = jnp.cos(rz), jnp.sin(rz)
        Rx = jnp.array([[1, 0, 0], [0, cxr, -sxr], [0, sxr, cxr]], jnp.float32)
        Ry = jnp.array([[cyr, 0, syr], [0, 1, 0], [-syr, 0, cyr]], jnp.float32)
        Rz = jnp.array([[czr, -szr, 0], [szr, czr, 0], [0, 0, 1]], jnp.float32)
        return Rz @ Ry @ Rx

    def make_rt(R, t):
        top = jnp.concatenate([R, t.reshape(3, 1)], axis=1)
        return jnp.concatenate(
            [top, jnp.array([[0.0, 0.0, 0.0, 1.0]], jnp.float32)], axis=0)

    def project(p_world, Rt_):
        pc = p_world @ Rt_[:3, :3].T + Rt_[:3, 3]
        return pc[:, :2] / pc[:, 2:3] * f + centre

    Rt = make_rt(rot(0.02, -0.03, 0.01),
                 jnp.array([0.05, -0.02, 0.10], jnp.float32))
    others = [
        (rot(0.01, 0.04, -0.02), jnp.array([-0.25, 0.02, 0.00], jnp.float32)),
        (rot(-0.03, -0.05, 0.02), jnp.array([-0.45, -0.03, 0.05], jnp.float32)),
        (rot(0.02, 0.06, 0.01), jnp.array([0.35, 0.05, -0.05], jnp.float32)),
    ]
    Rts_others = jnp.stack([make_rt(R, t) for R, t in others])
    uv = project(pts_w, Rt)
    uvs_others = jnp.stack([project(pts_w, make_rt(R, t)) for R, t in others])

    # run the Pallas kernel
    kpts3d, depth, best, valid = triangulate_pallas(
        uv, uvs_others, Rt, Rts_others, f, centre, max_error, min_dis)
    jax.block_until_ready((kpts3d, depth, best, valid))

    # validate against the pure-JAX reference of the PyTorch module
    rk, rd, rb, rv = triangulate_ref(
        uv, uvs_others, Rt, Rts_others, f, centre, max_error, min_dis)
    assert bool(jnp.array_equal(valid, rv))
    assert bool(jnp.allclose(kpts3d, rk, rtol=1e-2, atol=1e-2))
    assert bool(jnp.allclose(depth, rd, rtol=1e-2, atol=1e-2))
    assert bool(jnp.allclose(best, rb, rtol=1e-2, atol=1e-2))

    print("KERNEL_OK")
</pallas_src>

<mosaic_0001>
module attributes {stable_mosaic.version = 11 : i64} {
  func.func @_tri_kernel(%arg0: i32, %arg1: memref<2x8x128xf32, #tpu.memory_space<vmem>>, %arg2: memref<3x2x8x128xf32, #tpu.memory_space<vmem>>, %arg3: memref<27xf32, #tpu.memory_space<smem>>, %arg4: memref<9xf32, #tpu.memory_space<smem>>, %arg5: memref<9xf32, #tpu.memory_space<smem>>, %arg6: memref<9xf32, #tpu.memory_space<smem>>, %arg7: memref<3xf32, #tpu.memory_space<smem>>, %arg8: memref<8xf32, #tpu.memory_space<smem>>, %arg9: memref<1xf32, #tpu.memory_space<smem>>, %arg10: memref<3x8x128xf32, #tpu.memory_space<vmem>>, %arg11: memref<8x128xf32, #tpu.memory_space<vmem>>, %arg12: memref<8x128xf32, #tpu.memory_space<vmem>>) attributes {dimension_semantics = [#tpu.dimension_semantics<parallel>], iteration_bounds = array<i64: 1>, scalar_prefetch = 0 : i64, scratch_operands = 0 : i64, tpu.core_type = #tpu.core_type<tc>, window_params = [{transform_indices = @transform_0, window_bounds = array<i64: 2, 8, 128>}, {transform_indices = @transform_1, window_bounds = array<i64: 3, 2, 8, 128>}, {transform_indices = @transform_2, window_bounds = array<i64: 27>}, {transform_indices = @transform_3, window_bounds = array<i64: 9>}, {transform_indices = @transform_4, window_bounds = array<i64: 9>}, {transform_indices = @transform_5, window_bounds = array<i64: 9>}, {transform_indices = @transform_6, window_bounds = array<i64: 3>}, {transform_indices = @transform_7, window_bounds = array<i64: 8>}, {transform_indices = @transform_8, window_bounds = array<i64: 1>}, {transform_indices = @transform_9, window_bounds = array<i64: 3, 8, 128>}, {transform_indices = @transform_10, window_bounds = array<i64: 8, 128>}, {transform_indices = @transform_11, window_bounds = array<i64: 8, 128>}]} {
    %c0 = arith.constant 0 : index
    %0 = memref.load %arg8[%c0] : memref<8xf32, #tpu.memory_space<smem>>
    %c1 = arith.constant 1 : index
    %1 = memref.load %arg8[%c1] : memref<8xf32, #tpu.memory_space<smem>>
    %c2 = arith.constant 2 : index
    %2 = memref.load %arg8[%c2] : memref<8xf32, #tpu.memory_space<smem>>
    %c3 = arith.constant 3 : index
    %3 = memref.load %arg8[%c3] : memref<8xf32, #tpu.memory_space<smem>>
    %c4 = arith.constant 4 : index
    %4 = memref.load %arg8[%c4] : memref<8xf32, #tpu.memory_space<smem>>
    %c5 = arith.constant 5 : index
    %5 = memref.load %arg8[%c5] : memref<8xf32, #tpu.memory_space<smem>>
    %c6 = arith.constant 6 : index
    %6 = memref.load %arg8[%c6] : memref<8xf32, #tpu.memory_space<smem>>
    %c7 = arith.constant 7 : index
    %7 = memref.load %arg8[%c7] : memref<8xf32, #tpu.memory_space<smem>>
    %c0_0 = arith.constant 0 : index
    %8 = memref.load %arg9[%c0_0] : memref<1xf32, #tpu.memory_space<smem>>
    %c0_1 = arith.constant 0 : index
    %9 = memref.load %arg3[%c0_1] : memref<27xf32, #tpu.memory_space<smem>>
    %c1_2 = arith.constant 1 : index
    %10 = memref.load %arg3[%c1_2] : memref<27xf32, #tpu.memory_space<smem>>
    %c2_3 = arith.constant 2 : index
    %11 = memref.load %arg3[%c2_3] : memref<27xf32, #tpu.memory_space<smem>>
    %c3_4 = arith.constant 3 : index
    %12 = memref.load %arg3[%c3_4] : memref<27xf32, #tpu.memory_space<smem>>
    %c4_5 = arith.constant 4 : index
    %13 = memref.load %arg3[%c4_5] : memref<27xf32, #tpu.memory_space<smem>>
    %c5_6 = arith.constant 5 : index
    %14 = memref.load %arg3[%c5_6] : memref<27xf32, #tpu.memory_space<smem>>
    %c6_7 = arith.constant 6 : index
    %15 = memref.load %arg3[%c6_7] : memref<27xf32, #tpu.memory_space<smem>>
    %c7_8 = arith.constant 7 : index
    %16 = memref.load %arg3[%c7_8] : memref<27xf32, #tpu.memory_space<smem>>
    %c8 = arith.constant 8 : index
    %17 = memref.load %arg3[%c8] : memref<27xf32, #tpu.memory_space<smem>>
    %c0_9 = arith.constant 0 : index
    %18 = memref.load %arg4[%c0_9] : memref<9xf32, #tpu.memory_space<smem>>
    %c1_10 = arith.constant 1 : index
    %19 = memref.load %arg4[%c1_10] : memref<9xf32, #tpu.memory_space<smem>>
    %c2_11 = arith.constant 2 : index
    %20 = memref.load %arg4[%c2_11] : memref<9xf32, #tpu.memory_space<smem>>
    %c0_12 = arith.constant 0 : index
    %21 = memref.load %arg5[%c0_12] : memref<9xf32, #tpu.memory_space<smem>>
    %c1_13 = arith.constant 1 : index
    %22 = memref.load %arg5[%c1_13] : memref<9xf32, #tpu.memory_space<smem>>
    %c2_14 = arith.constant 2 : index
    %23 = memref.load %arg5[%c2_14] : memref<9xf32, #tpu.memory_space<smem>>
    %c9 = arith.constant 9 : index
    %24 = memref.load %arg3[%c9] : memref<27xf32, #tpu.memory_space<smem>>
    %c10 = arith.constant 10 : index
    %25 = memref.load %arg3[%c10] : memref<27xf32, #tpu.memory_space<smem>>
    %c11 = arith.constant 11 : index
    %26 = memref.load %arg3[%c11] : memref<27xf32, #tpu.memory_space<smem>>
    %c12 = arith.constant 12 : index
    %27 = memref.load %arg3[%c12] : memref<27xf32, #tpu.memory_space<smem>>
    %c13 = arith.constant 13 : index
    %28 = memref.load %arg3[%c13] : memref<27xf32, #tpu.memory_space<smem>>
    %c14 = arith.constant 14 : index
    %29 = memref.load %arg3[%c14] : memref<27xf32, #tpu.memory_space<smem>>
    %c15 = arith.constant 15 : index
    %30 = memref.load %arg3[%c15] : memref<27xf32, #tpu.memory_space<smem>>
    %c16 = arith.constant 16 : index
    %31 = memref.load %arg3[%c16] : memref<27xf32, #tpu.memory_space<smem>>
    %c17 = arith.constant 17 : index
    %32 = memref.load %arg3[%c17] : memref<27xf32, #tpu.memory_space<smem>>
    %c3_15 = arith.constant 3 : index
    %33 = memref.load %arg4[%c3_15] : memref<9xf32, #tpu.memory_space<smem>>
    %c4_16 = arith.constant 4 : index
    %34 = memref.load %arg4[%c4_16] : memref<9xf32, #tpu.memory_space<smem>>
    %c5_17 = arith.constant 5 : index
    %35 = memref.load %arg4[%c5_17] : memref<9xf32, #tpu.memory_space<smem>>
    %c3_18 = arith.constant 3 : index
    %36 = memref.load %arg5[%c3_18] : memref<9xf32, #tpu.memory_space<smem>>
    %c4_19 = arith.constant 4 : index
    %37 = memref.load %arg5[%c4_19] : memref<9xf32, #tpu.memory_space<smem>>
    %c5_20 = arith.constant 5 : index
    %38 = memref.load %arg5[%c5_20] : memref<9xf32, #tpu.memory_space<smem>>
    %c18 = arith.constant 18 : index
    %39 = memref.load %arg3[%c18] : memref<27xf32, #tpu.memory_space<smem>>
    %c19 = arith.constant 19 : index
    %40 = memref.load %arg3[%c19] : memref<27xf32, #tpu.memory_space<smem>>
    %c20 = arith.constant 20 : index
    %41 = memref.load %arg3[%c20] : memref<27xf32, #tpu.memory_space<smem>>
    %c21 = arith.constant 21 : index
    %42 = memref.load %arg3[%c21] : memref<27xf32, #tpu.memory_space<smem>>
    %c22 = arith.constant 22 : index
    %43 = memref.load %arg3[%c22] : memref<27xf32, #tpu.memory_space<smem>>
    %c23 = arith.constant 23 : index
    %44 = memref.load %arg3[%c23] : memref<27xf32, #tpu.memory_space<smem>>
    %c24 = arith.constant 24 : index
    %45 = memref.load %arg3[%c24] : memref<27xf32, #tpu.memory_space<smem>>
    %c25 = arith.constant 25 : index
    %46 = memref.load %arg3[%c25] : memref<27xf32, #tpu.memory_space<smem>>
    %c26 = arith.constant 26 : index
    %47 = memref.load %arg3[%c26] : memref<27xf32, #tpu.memory_space<smem>>
    %c6_21 = arith.constant 6 : index
    %48 = memref.load %arg4[%c6_21] : memref<9xf32, #tpu.memory_space<smem>>
    %c7_22 = arith.constant 7 : index
    %49 = memref.load %arg4[%c7_22] : memref<9xf32, #tpu.memory_space<smem>>
    %c8_23 = arith.constant 8 : index
    %50 = memref.load %arg4[%c8_23] : memref<9xf32, #tpu.memory_space<smem>>
    %c6_24 = arith.constant 6 : index
    %51 = memref.load %arg5[%c6_24] : memref<9xf32, #tpu.memory_space<smem>>
    %c7_25 = arith.constant 7 : index
    %52 = memref.load %arg5[%c7_25] : memref<9xf32, #tpu.memory_space<smem>>
    %c8_26 = arith.constant 8 : index
    %53 = memref.load %arg5[%c8_26] : memref<9xf32, #tpu.memory_space<smem>>
    %c0_27 = arith.constant 0 : index
    %54 = memref.load %arg6[%c0_27] : memref<9xf32, #tpu.memory_space<smem>>
    %c1_28 = arith.constant 1 : index
    %55 = memref.load %arg6[%c1_28] : memref<9xf32, #tpu.memory_space<smem>>
    %c2_29 = arith.constant 2 : index
    %56 = memref.load %arg6[%c2_29] : memref<9xf32, #tpu.memory_space<smem>>
    %c3_30 = arith.constant 3 : index
    %57 = memref.load %arg6[%c3_30] : memref<9xf32, #tpu.memory_space<smem>>
    %c4_31 = arith.constant 4 : index
    %58 = memref.load %arg6[%c4_31] : memref<9xf32, #tpu.memory_space<smem>>
    %c5_32 = arith.constant 5 : index
    %59 = memref.load %arg6[%c5_32] : memref<9xf32, #tpu.memory_space<smem>>
    %c6_33 = arith.constant 6 : index
    %60 = memref.load %arg6[%c6_33] : memref<9xf32, #tpu.memory_space<smem>>
    %c7_34 = arith.constant 7 : index
    %61 = memref.load %arg6[%c7_34] : memref<9xf32, #tpu.memory_space<smem>>
    %c8_35 = arith.constant 8 : index
    %62 = memref.load %arg6[%c8_35] : memref<9xf32, #tpu.memory_space<smem>>
    %c0_36 = arith.constant 0 : index
    %63 = memref.load %arg7[%c0_36] : memref<3xf32, #tpu.memory_space<smem>>
    %c1_37 = arith.constant 1 : index
    %64 = memref.load %arg7[%c1_37] : memref<3xf32, #tpu.memory_space<smem>>
    %c2_38 = arith.constant 2 : index
    %65 = memref.load %arg7[%c2_38] : memref<3xf32, #tpu.memory_space<smem>>
    %c0_i32 = arith.constant 0 : i32
    %c8_i32 = arith.constant 8 : i32
    %66 = arith.muli %c0_i32, %c8_i32 : i32
    %67 = tpu.assume_multiple %66, 8 : i32
    %c0_39 = arith.constant 0 : index
    %68 = arith.index_cast %67 : i32 to index
    %c0_40 = arith.constant 0 : index
    %69 = vector.load %arg1[%c0_39, %68, %c0_40] : memref<2x8x128xf32, #tpu.memory_space<vmem>>, vector<1x8x128xf32>
    %70 = vector.shape_cast %69 : vector<1x8x128xf32> to vector<8x128xf32>
    %c1_41 = arith.constant 1 : index
    %71 = arith.index_cast %67 : i32 to index
    %c0_42 = arith.constant 0 : index
    %72 = vector.load %arg1[%c1_41, %71, %c0_42] : memref<2x8x128xf32, #tpu.memory_space<vmem>>, vector<1x8x128xf32>
    %73 = vector.shape_cast %72 : vector<1x8x128xf32> to vector<8x128xf32>
    %74 = vector.broadcast %2 : f32 to vector<8x128xf32>
    %75 = arith.subf %70, %74 : vector<8x128xf32>
    %76 = vector.broadcast %4 : f32 to vector<8x128xf32>
    %77 = arith.mulf %75, %76 : vector<8x128xf32>
    %78 = vector.broadcast %3 : f32 to vector<8x128xf32>
    %79 = arith.subf %73, %78 : vector<8x128xf32>
    %80 = vector.broadcast %5 : f32 to vector<8x128xf32>
    %81 = arith.mulf %79, %80 : vector<8x128xf32>
    %82 = arith.mulf %77, %77 : vector<8x128xf32>
    %83 = arith.mulf %81, %81 : vector<8x128xf32>
    %84 = arith.addf %82, %83 : vector<8x128xf32>
    %cst = arith.constant 1.000000e+00 : f32
    %85 = vector.broadcast %cst : f32 to vector<8x128xf32>
    %86 = arith.addf %84, %85 : vector<8x128xf32>
    %87 = math.rsqrt %86 : vector<8x128xf32>
    %88 = arith.mulf %77, %87 : vector<8x128xf32>
    %89 = arith.mulf %81, %87 : vector<8x128xf32>
    %cst_43 = arith.constant 0.000000e+00 : f32
    %90 = vector.broadcast %cst_43 : f32 to vector<8x128xf32>
    %cst_44 = arith.constant 0.000000e+00 : f32
    %91 = vector.broadcast %cst_44 : f32 to vector<8x128xf32>
    %cst_45 = arith.constant 0.000000e+00 : f32
    %92 = vector.broadcast %cst_45 : f32 to vector<8x128xf32>
    %cst_46 = arith.constant 0.000000e+00 : f32
    %93 = vector.broadcast %cst_46 : f32 to vector<8x128xf32>
    %c0_47 = arith.constant 0 : index
    %c0_48 = arith.constant 0 : index
    %94 = arith.index_cast %67 : i32 to index
    %c0_49 = arith.constant 0 : index
    %95 = vector.load %arg2[%c0_47, %c0_48, %94, %c0_49] : memref<3x2x8x128xf32, #tpu.memory_space<vmem>>, vector<1x1x8x128xf32>
    %96 = vector.shape_cast %95 : vector<1x1x8x128xf32> to vector<8x128xf32>
    %c0_50 = arith.constant 0 : index
    %c1_51 = arith.constant 1 : index
    %97 = arith.index_cast %67 : i32 to index
    %c0_52 = arith.constant 0 : index
    %98 = vector.load %arg2[%c0_50, %c1_51, %97, %c0_52] : memref<3x2x8x128xf32, #tpu.memory_space<vmem>>, vector<1x1x8x128xf32>
    %99 = vector.shape_cast %98 : vector<1x1x8x128xf32> to vector<8x128xf32>
    %100 = vector.broadcast %2 : f32 to vector<8x128xf32>
    %101 = arith.subf %96, %100 : vector<8x128xf32>
    %102 = vector.broadcast %4 : f32 to vector<8x128xf32>
    %103 = arith.mulf %101, %102 : vector<8x128xf32>
    %104 = vector.broadcast %3 : f32 to vector<8x128xf32>
    %105 = arith.subf %99, %104 : vector<8x128xf32>
    %106 = vector.broadcast %5 : f32 to vector<8x128xf32>
    %107 = arith.mulf %105, %106 : vector<8x128xf32>
    %108 = vector.broadcast %9 : f32 to vector<8x128xf32>
    %109 = arith.mulf %108, %103 : vector<8x128xf32>
    %110 = vector.broadcast %10 : f32 to vector<8x128xf32>
    %111 = arith.mulf %110, %107 : vector<8x128xf32>
    %112 = arith.addf %109, %111 : vector<8x128xf32>
    %113 = vector.broadcast %11 : f32 to vector<8x128xf32>
    %114 = arith.addf %112, %113 : vector<8x128xf32>
    %115 = vector.broadcast %12 : f32 to vector<8x128xf32>
    %116 = arith.mulf %115, %103 : vector<8x128xf32>
    %117 = vector.broadcast %13 : f32 to vector<8x128xf32>
    %118 = arith.mulf %117, %107 : vector<8x128xf32>
    %119 = arith.addf %116, %118 : vector<8x128xf32>
    %120 = vector.broadcast %14 : f32 to vector<8x128xf32>
    %121 = arith.addf %119, %120 : vector<8x128xf32>
    %122 = vector.broadcast %15 : f32 to vector<8x128xf32>
    %123 = arith.mulf %122, %103 : vector<8x128xf32>
    %124 = vector.broadcast %16 : f32 to vector<8x128xf32>
    %125 = arith.mulf %124, %107 : vector<8x128xf32>
    %126 = arith.addf %123, %125 : vector<8x128xf32>
    %127 = vector.broadcast %17 : f32 to vector<8x128xf32>
    %128 = arith.addf %126, %127 : vector<8x128xf32>
    %129 = arith.mulf %89, %128 : vector<8x128xf32>
    %130 = arith.mulf %87, %121 : vector<8x128xf32>
    %131 = arith.subf %129, %130 : vector<8x128xf32>
    %132 = arith.mulf %87, %114 : vector<8x128xf32>
    %133 = arith.mulf %88, %128 : vector<8x128xf32>
    %134 = arith.subf %132, %133 : vector<8x128xf32>
    %135 = arith.mulf %88, %121 : vector<8x128xf32>
    %136 = arith.mulf %89, %114 : vector<8x128xf32>
    %137 = arith.subf %135, %136 : vector<8x128xf32>
    %138 = arith.mulf %121, %137 : vector<8x128xf32>
    %139 = arith.mulf %128, %134 : vector<8x128xf32>
    %140 = arith.subf %138, %139 : vector<8x128xf32>
    %141 = arith.mulf %128, %131 : vector<8x128xf32>
    %142 = arith.mulf %114, %137 : vector<8x128xf32>
    %143 = arith.subf %141, %142 : vector<8x128xf32>
    %144 = arith.mulf %114, %134 : vector<8x128xf32>
    %145 = arith.mulf %121, %131 : vector<8x128xf32>
    %146 = arith.subf %144, %145 : vector<8x128xf32>
    %147 = vector.broadcast %18 : f32 to vector<8x128xf32>
    %148 = arith.mulf %140, %147 : vector<8x128xf32>
    %149 = vector.broadcast %19 : f32 to vector<8x128xf32>
    %150 = arith.mulf %143, %149 : vector<8x128xf32>
    %151 = arith.addf %148, %150 : vector<8x128xf32>
    %152 = vector.broadcast %20 : f32 to vector<8x128xf32>
    %153 = arith.mulf %146, %152 : vector<8x128xf32>
    %154 = arith.addf %151, %153 : vector<8x128xf32>
    %155 = arith.mulf %140, %88 : vector<8x128xf32>
    %156 = arith.mulf %143, %89 : vector<8x128xf32>
    %157 = arith.addf %155, %156 : vector<8x128xf32>
    %158 = arith.mulf %146, %87 : vector<8x128xf32>
    %159 = arith.addf %157, %158 : vector<8x128xf32>
    %160 = tpu.reciprocal %159 {approx = true} : vector<8x128xf32> -> vector<8x128xf32>
    %161 = arith.mulf %159, %160 : vector<8x128xf32>
    %cst_53 = arith.constant 2.000000e+00 : f32
    %162 = vector.broadcast %cst_53 : f32 to vector<8x128xf32>
    %163 = arith.subf %162, %161 : vector<8x128xf32>
    %164 = arith.mulf %160, %163 : vector<8x128xf32>
    %165 = arith.mulf %154, %164 : vector<8x128xf32>
    %166 = arith.mulf %88, %165 : vector<8x128xf32>
    %167 = arith.mulf %89, %165 : vector<8x128xf32>
    %168 = arith.mulf %87, %165 : vector<8x128xf32>
    %169 = vector.broadcast %9 : f32 to vector<8x128xf32>
    %170 = arith.mulf %88, %169 : vector<8x128xf32>
    %171 = vector.broadcast %12 : f32 to vector<8x128xf32>
    %172 = arith.mulf %89, %171 : vector<8x128xf32>
    %173 = arith.addf %170, %172 : vector<8x128xf32>
    %174 = vector.broadcast %15 : f32 to vector<8x128xf32>
    %175 = arith.mulf %87, %174 : vector<8x128xf32>
    %176 = arith.addf %173, %175 : vector<8x128xf32>
    %177 = vector.broadcast %10 : f32 to vector<8x128xf32>
    %178 = arith.mulf %88, %177 : vector<8x128xf32>
    %179 = vector.broadcast %13 : f32 to vector<8x128xf32>
    %180 = arith.mulf %89, %179 : vector<8x128xf32>
    %181 = arith.addf %178, %180 : vector<8x128xf32>
    %182 = vector.broadcast %16 : f32 to vector<8x128xf32>
    %183 = arith.mulf %87, %182 : vector<8x128xf32>
    %184 = arith.addf %181, %183 : vector<8x128xf32>
    %185 = vector.broadcast %11 : f32 to vector<8x128xf32>
    %186 = arith.mulf %88, %185 : vector<8x128xf32>
    %187 = vector.broadcast %14 : f32 to vector<8x128xf32>
    %188 = arith.mulf %89, %187 : vector<8x128xf32>
    %189 = arith.addf %186, %188 : vector<8x128xf32>
    %190 = vector.broadcast %17 : f32 to vector<8x128xf32>
    %191 = arith.mulf %87, %190 : vector<8x128xf32>
    %192 = arith.addf %189, %191 : vector<8x128xf32>
    %193 = vector.broadcast %23 : f32 to vector<8x128xf32>
    %194 = arith.subf %192, %193 : vector<8x128xf32>
    %cst_54 = arith.constant 1.000000e+01 : f32
    %195 = vector.broadcast %cst_54 : f32 to vector<8x128xf32>
    %196 = arith.mulf %195, %192 : vector<8x128xf32>
    %197 = vector.broadcast %23 : f32 to vector<8x128xf32>
    %198 = arith.subf %196, %197 : vector<8x128xf32>
    %199 = arith.mulf %194, %198 : vector<8x128xf32>
    %200 = tpu.reciprocal %199 {approx = true} : vector<8x128xf32> -> vector<8x128xf32>
    %201 = vector.broadcast %23 : f32 to vector<8x128xf32>
    %202 = arith.mulf %176, %201 : vector<8x128xf32>
    %203 = vector.broadcast %21 : f32 to vector<8x128xf32>
    %204 = arith.mulf %203, %192 : vector<8x128xf32>
    %205 = arith.subf %202, %204 : vector<8x128xf32>
    %206 = vector.broadcast %6 : f32 to vector<8x128xf32>
    %207 = arith.mulf %206, %205 : vector<8x128xf32>
    %208 = arith.mulf %207, %200 : vector<8x128xf32>
    %209 = vector.broadcast %23 : f32 to vector<8x128xf32>
    %210 = arith.mulf %184, %209 : vector<8x128xf32>
    %211 = vector.broadcast %22 : f32 to vector<8x128xf32>
    %212 = arith.mulf %211, %192 : vector<8x128xf32>
    %213 = arith.subf %210, %212 : vector<8x128xf32>
    %214 = vector.broadcast %7 : f32 to vector<8x128xf32>
    %215 = arith.mulf %214, %213 : vector<8x128xf32>
    %216 = arith.mulf %215, %200 : vector<8x128xf32>
    %217 = arith.mulf %208, %208 : vector<8x128xf32>
    %218 = arith.mulf %216, %216 : vector<8x128xf32>
    %219 = arith.addf %217, %218 : vector<8x128xf32>
    %220 = arith.mulf %165, %192 : vector<8x128xf32>
    %221 = vector.broadcast %23 : f32 to vector<8x128xf32>
    %222 = arith.subf %220, %221 : vector<8x128xf32>
    %223 = tpu.reciprocal %222 {approx = true} : vector<8x128xf32> -> vector<8x128xf32>
    %224 = arith.mulf %165, %176 : vector<8x128xf32>
    %225 = vector.broadcast %21 : f32 to vector<8x128xf32>
    %226 = arith.subf %224, %225 : vector<8x128xf32>
    %227 = arith.mulf %226, %223 : vector<8x128xf32>
    %228 = vector.broadcast %0 : f32 to vector<8x128xf32>
    %229 = arith.mulf %227, %228 : vector<8x128xf32>
    %230 = vector.broadcast %2 : f32 to vector<8x128xf32>
    %231 = arith.addf %229, %230 : vector<8x128xf32>
    %232 = arith.mulf %165, %184 : vector<8x128xf32>
    %233 = vector.broadcast %22 : f32 to vector<8x128xf32>
    %234 = arith.subf %232, %233 : vector<8x128xf32>
    %235 = arith.mulf %234, %223 : vector<8x128xf32>
    %236 = vector.broadcast %1 : f32 to vector<8x128xf32>
    %237 = arith.mulf %235, %236 : vector<8x128xf32>
    %238 = vector.broadcast %3 : f32 to vector<8x128xf32>
    %239 = arith.addf %237, %238 : vector<8x128xf32>
    %240 = arith.subf %231, %96 : vector<8x128xf32>
    %241 = arith.subf %239, %99 : vector<8x128xf32>
    %242 = arith.mulf %240, %240 : vector<8x128xf32>
    %243 = arith.mulf %241, %241 : vector<8x128xf32>
    %244 = arith.addf %242, %243 : vector<8x128xf32>
    %cst_55 = arith.constant 9.99999997E-7 : f32
    %245 = vector.broadcast %cst_55 : f32 to vector<8x128xf32>
    %246 = arith.cmpf ogt, %168, %245 : vector<8x128xf32>
    %247 = arith.cmpf ogt, %219, %93 : vector<8x128xf32>
    %248 = arith.andi %246, %247 : vector<8x128xi1>
    %249 = vector.broadcast %8 : f32 to vector<8x128xf32>
    %250 = arith.cmpf olt, %244, %249 : vector<8x128xf32>
    %251 = arith.andi %248, %250 : vector<8x128xi1>
    %252 = arith.minimumf %96, %99 : vector<8x128xf32>
    %cst_56 = arith.constant 0.000000e+00 : f32
    %253 = vector.broadcast %cst_56 : f32 to vector<8x128xf32>
    %254 = arith.cmpf ogt, %252, %253 : vector<8x128xf32>
    %255 = arith.andi %251, %254 : vector<8x128xi1>
    %256 = arith.select %255, %166, %90 : vector<8x128xi1>, vector<8x128xf32>
    %257 = arith.select %255, %167, %91 : vector<8x128xi1>, vector<8x128xf32>
    %258 = arith.select %255, %168, %92 : vector<8x128xi1>, vector<8x128xf32>
    %259 = arith.select %255, %219, %93 : vector<8x128xi1>, vector<8x128xf32>
    %c1_57 = arith.constant 1 : index
    %c0_58 = arith.constant 0 : index
    %260 = arith.index_cast %67 : i32 to index
    %c0_59 = arith.constant 0 : index
    %261 = vector.load %arg2[%c1_57, %c0_58, %260, %c0_59] : memref<3x2x8x128xf32, #tpu.memory_space<vmem>>, vector<1x1x8x128xf32>
    %262 = vector.shape_cast %261 : vector<1x1x8x128xf32> to vector<8x128xf32>
    %c1_60 = arith.constant 1 : index
    %c1_61 = arith.constant 1 : index
    %263 = arith.index_cast %67 : i32 to index
    %c0_62 = arith.constant 0 : index
    %264 = vector.load %arg2[%c1_60, %c1_61, %263, %c0_62] : memref<3x2x8x128xf32, #tpu.memory_space<vmem>>, vector<1x1x8x128xf32>
    %265 = vector.shape_cast %264 : vector<1x1x8x128xf32> to vector<8x128xf32>
    %266 = vector.broadcast %2 : f32 to vector<8x128xf32>
    %267 = arith.subf %262, %266 : vector<8x128xf32>
    %268 = vector.broadcast %4 : f32 to vector<8x128xf32>
    %269 = arith.mulf %267, %268 : vector<8x128xf32>
    %270 = vector.broadcast %3 : f32 to vector<8x128xf32>
    %271 = arith.subf %265, %270 : vector<8x128xf32>
    %272 = vector.broadcast %5 : f32 to vector<8x128xf32>
    %273 = arith.mulf %271, %272 : vector<8x128xf32>
    %274 = vector.broadcast %24 : f32 to vector<8x128xf32>
    %275 = arith.mulf %274, %269 : vector<8x128xf32>
    %276 = vector.broadcast %25 : f32 to vector<8x128xf32>
    %277 = arith.mulf %276, %273 : vector<8x128xf32>
    %278 = arith.addf %275, %277 : vector<8x128xf32>
    %279 = vector.broadcast %26 : f32 to vector<8x128xf32>
    %280 = arith.addf %278, %279 : vector<8x128xf32>
    %281 = vector.broadcast %27 : f32 to vector<8x128xf32>
    %282 = arith.mulf %281, %269 : vector<8x128xf32>
    %283 = vector.broadcast %28 : f32 to vector<8x128xf32>
    %284 = arith.mulf %283, %273 : vector<8x128xf32>
    %285 = arith.addf %282, %284 : vector<8x128xf32>
    %286 = vector.broadcast %29 : f32 to vector<8x128xf32>
    %287 = arith.addf %285, %286 : vector<8x128xf32>
    %288 = vector.broadcast %30 : f32 to vector<8x128xf32>
    %289 = arith.mulf %288, %269 : vector<8x128xf32>
    %290 = vector.broadcast %31 : f32 to vector<8x128xf32>
    %291 = arith.mulf %290, %273 : vector<8x128xf32>
    %292 = arith.addf %289, %291 : vector<8x128xf32>
    %293 = vector.broadcast %32 : f32 to vector<8x128xf32>
    %294 = arith.addf %292, %293 : vector<8x128xf32>
    %295 = arith.mulf %89, %294 : vector<8x128xf32>
    %296 = arith.mulf %87, %287 : vector<8x128xf32>
    %297 = arith.subf %295, %296 : vector<8x128xf32>
    %298 = arith.mulf %87, %280 : vector<8x128xf32>
    %299 = arith.mulf %88, %294 : vector<8x128xf32>
    %300 = arith.subf %298, %299 : vector<8x128xf32>
    %301 = arith.mulf %88, %287 : vector<8x128xf32>
    %302 = arith.mulf %89, %280 : vector<8x128xf32>
    %303 = arith.subf %301, %302 : vector<8x128xf32>
    %304 = arith.mulf %287, %303 : vector<8x128xf32>
    %305 = arith.mulf %294, %300 : vector<8x128xf32>
    %306 = arith.subf %304, %305 : vector<8x128xf32>
    %307 = arith.mulf %294, %297 : vector<8x128xf32>
    %308 = arith.mulf %280, %303 : vector<8x128xf32>
    %309 = arith.subf %307, %308 : vector<8x128xf32>
    %310 = arith.mulf %280, %300 : vector<8x128xf32>
    %311 = arith.mulf %287, %297 : vector<8x128xf32>
    %312 = arith.subf %310, %311 : vector<8x128xf32>
    %313 = vector.broadcast %33 : f32 to vector<8x128xf32>
    %314 = arith.mulf %306, %313 : vector<8x128xf32>
    %315 = vector.broadcast %34 : f32 to vector<8x128xf32>
    %316 = arith.mulf %309, %315 : vector<8x128xf32>
    %317 = arith.addf %314, %316 : vector<8x128xf32>
    %318 = vector.broadcast %35 : f32 to vector<8x128xf32>
    %319 = arith.mulf %312, %318 : vector<8x128xf32>
    %320 = arith.addf %317, %319 : vector<8x128xf32>
    %321 = arith.mulf %306, %88 : vector<8x128xf32>
    %322 = arith.mulf %309, %89 : vector<8x128xf32>
    %323 = arith.addf %321, %322 : vector<8x128xf32>
    %324 = arith.mulf %312, %87 : vector<8x128xf32>
    %325 = arith.addf %323, %324 : vector<8x128xf32>
    %326 = tpu.reciprocal %325 {approx = true} : vector<8x128xf32> -> vector<8x128xf32>
    %327 = arith.mulf %325, %326 : vector<8x128xf32>
    %cst_63 = arith.constant 2.000000e+00 : f32
    %328 = vector.broadcast %cst_63 : f32 to vector<8x128xf32>
    %329 = arith.subf %328, %327 : vector<8x128xf32>
    %330 = arith.mulf %326, %329 : vector<8x128xf32>
    %331 = arith.mulf %320, %330 : vector<8x128xf32>
    %332 = arith.mulf %88, %331 : vector<8x128xf32>
    %333 = arith.mulf %89, %331 : vector<8x128xf32>
    %334 = arith.mulf %87, %331 : vector<8x128xf32>
    %335 = vector.broadcast %24 : f32 to vector<8x128xf32>
    %336 = arith.mulf %88, %335 : vector<8x128xf32>
    %337 = vector.broadcast %27 : f32 to vector<8x128xf32>
    %338 = arith.mulf %89, %337 : vector<8x128xf32>
    %339 = arith.addf %336, %338 : vector<8x128xf32>
    %340 = vector.broadcast %30 : f32 to vector<8x128xf32>
    %341 = arith.mulf %87, %340 : vector<8x128xf32>
    %342 = arith.addf %339, %341 : vector<8x128xf32>
    %343 = vector.broadcast %25 : f32 to vector<8x128xf32>
    %344 = arith.mulf %88, %343 : vector<8x128xf32>
    %345 = vector.broadcast %28 : f32 to vector<8x128xf32>
    %346 = arith.mulf %89, %345 : vector<8x128xf32>
    %347 = arith.addf %344, %346 : vector<8x128xf32>
    %348 = vector.broadcast %31 : f32 to vector<8x128xf32>
    %349 = arith.mulf %87, %348 : vector<8x128xf32>
    %350 = arith.addf %347, %349 : vector<8x128xf32>
    %351 = vector.broadcast %26 : f32 to vector<8x128xf32>
    %352 = arith.mulf %88, %351 : vector<8x128xf32>
    %353 = vector.broadcast %29 : f32 to vector<8x128xf32>
    %354 = arith.mulf %89, %353 : vector<8x128xf32>
    %355 = arith.addf %352, %354 : vector<8x128xf32>
    %356 = vector.broadcast %32 : f32 to vector<8x128xf32>
    %357 = arith.mulf %87, %356 : vector<8x128xf32>
    %358 = arith.addf %355, %357 : vector<8x128xf32>
    %359 = vector.broadcast %38 : f32 to vector<8x128xf32>
    %360 = arith.subf %358, %359 : vector<8x128xf32>
    %cst_64 = arith.constant 1.000000e+01 : f32
    %361 = vector.broadcast %cst_64 : f32 to vector<8x128xf32>
    %362 = arith.mulf %361, %358 : vector<8x128xf32>
    %363 = vector.broadcast %38 : f32 to vector<8x128xf32>
    %364 = arith.subf %362, %363 : vector<8x128xf32>
    %365 = arith.mulf %360, %364 : vector<8x128xf32>
    %366 = tpu.reciprocal %365 {approx = true} : vector<8x128xf32> -> vector<8x128xf32>
    %367 = vector.broadcast %38 : f32 to vector<8x128xf32>
    %368 = arith.mulf %342, %367 : vector<8x128xf32>
    %369 = vector.broadcast %36 : f32 to vector<8x128xf32>
    %370 = arith.mulf %369, %358 : vector<8x128xf32>
    %371 = arith.subf %368, %370 : vector<8x128xf32>
    %372 = vector.broadcast %6 : f32 to vector<8x128xf32>
    %373 = arith.mulf %372, %371 : vector<8x128xf32>
    %374 = arith.mulf %373, %366 : vector<8x128xf32>
    %375 = vector.broadcast %38 : f32 to vector<8x128xf32>
    %376 = arith.mulf %350, %375 : vector<8x128xf32>
    %377 = vector.broadcast %37 : f32 to vector<8x128xf32>
    %378 = arith.mulf %377, %358 : vector<8x128xf32>
    %379 = arith.subf %376, %378 : vector<8x128xf32>
    %380 = vector.broadcast %7 : f32 to vector<8x128xf32>
    %381 = arith.mulf %380, %379 : vector<8x128xf32>
    %382 = arith.mulf %381, %366 : vector<8x128xf32>
    %383 = arith.mulf %374, %374 : vector<8x128xf32>
    %384 = arith.mulf %382, %382 : vector<8x128xf32>
    %385 = arith.addf %383, %384 : vector<8x128xf32>
    %386 = arith.mulf %331, %358 : vector<8x128xf32>
    %387 = vector.broadcast %38 : f32 to vector<8x128xf32>
    %388 = arith.subf %386, %387 : vector<8x128xf32>
    %389 = tpu.reciprocal %388 {approx = true} : vector<8x128xf32> -> vector<8x128xf32>
    %390 = arith.mulf %331, %342 : vector<8x128xf32>
    %391 = vector.broadcast %36 : f32 to vector<8x128xf32>
    %392 = arith.subf %390, %391 : vector<8x128xf32>
    %393 = arith.mulf %392, %389 : vector<8x128xf32>
    %394 = vector.broadcast %0 : f32 to vector<8x128xf32>
    %395 = arith.mulf %393, %394 : vector<8x128xf32>
    %396 = vector.broadcast %2 : f32 to vector<8x128xf32>
    %397 = arith.addf %395, %396 : vector<8x128xf32>
    %398 = arith.mulf %331, %350 : vector<8x128xf32>
    %399 = vector.broadcast %37 : f32 to vector<8x128xf32>
    %400 = arith.subf %398, %399 : vector<8x128xf32>
    %401 = arith.mulf %400, %389 : vector<8x128xf32>
    %402 = vector.broadcast %1 : f32 to vector<8x128xf32>
    %403 = arith.mulf %401, %402 : vector<8x128xf32>
    %404 = vector.broadcast %3 : f32 to vector<8x128xf32>
    %405 = arith.addf %403, %404 : vector<8x128xf32>
    %406 = arith.subf %397, %262 : vector<8x128xf32>
    %407 = arith.subf %405, %265 : vector<8x128xf32>
    %408 = arith.mulf %406, %406 : vector<8x128xf32>
    %409 = arith.mulf %407, %407 : vector<8x128xf32>
    %410 = arith.addf %408, %409 : vector<8x128xf32>
    %cst_65 = arith.constant 9.99999997E-7 : f32
    %411 = vector.broadcast %cst_65 : f32 to vector<8x128xf32>
    %412 = arith.cmpf ogt, %334, %411 : vector<8x128xf32>
    %413 = arith.cmpf ogt, %385, %259 : vector<8x128xf32>
    %414 = arith.andi %412, %413 : vector<8x128xi1>
    %415 = vector.broadcast %8 : f32 to vector<8x128xf32>
    %416 = arith.cmpf olt, %410, %415 : vector<8x128xf32>
    %417 = arith.andi %414, %416 : vector<8x128xi1>
    %418 = arith.minimumf %262, %265 : vector<8x128xf32>
    %cst_66 = arith.constant 0.000000e+00 : f32
    %419 = vector.broadcast %cst_66 : f32 to vector<8x128xf32>
    %420 = arith.cmpf ogt, %418, %419 : vector<8x128xf32>
    %421 = arith.andi %417, %420 : vector<8x128xi1>
    %422 = arith.select %421, %332, %256 : vector<8x128xi1>, vector<8x128xf32>
    %423 = arith.select %421, %333, %257 : vector<8x128xi1>, vector<8x128xf32>
    %424 = arith.select %421, %334, %258 : vector<8x128xi1>, vector<8x128xf32>
    %425 = arith.select %421, %385, %259 : vector<8x128xi1>, vector<8x128xf32>
    %c2_67 = arith.constant 2 : index
    %c0_68 = arith.constant 0 : index
    %426 = arith.index_cast %67 : i32 to index
    %c0_69 = arith.constant 0 : index
    %427 = vector.load %arg2[%c2_67, %c0_68, %426, %c0_69] : memref<3x2x8x128xf32, #tpu.memory_space<vmem>>, vector<1x1x8x128xf32>
    %428 = vector.shape_cast %427 : vector<1x1x8x128xf32> to vector<8x128xf32>
    %c2_70 = arith.constant 2 : index
    %c1_71 = arith.constant 1 : index
    %429 = arith.index_cast %67 : i32 to index
    %c0_72 = arith.constant 0 : index
    %430 = vector.load %arg2[%c2_70, %c1_71, %429, %c0_72] : memref<3x2x8x128xf32, #tpu.memory_space<vmem>>, vector<1x1x8x128xf32>
    %431 = vector.shape_cast %430 : vector<1x1x8x128xf32> to vector<8x128xf32>
    %432 = vector.broadcast %2 : f32 to vector<8x128xf32>
    %433 = arith.subf %428, %432 : vector<8x128xf32>
    %434 = vector.broadcast %4 : f32 to vector<8x128xf32>
    %435 = arith.mulf %433, %434 : vector<8x128xf32>
    %436 = vector.broadcast %3 : f32 to vector<8x128xf32>
    %437 = arith.subf %431, %436 : vector<8x128xf32>
    %438 = vector.broadcast %5 : f32 to vector<8x128xf32>
    %439 = arith.mulf %437, %438 : vector<8x128xf32>
    %440 = vector.broadcast %39 : f32 to vector<8x128xf32>
    %441 = arith.mulf %440, %435 : vector<8x128xf32>
    %442 = vector.broadcast %40 : f32 to vector<8x128xf32>
    %443 = arith.mulf %442, %439 : vector<8x128xf32>
    %444 = arith.addf %441, %443 : vector<8x128xf32>
    %445 = vector.broadcast %41 : f32 to vector<8x128xf32>
    %446 = arith.addf %444, %445 : vector<8x128xf32>
    %447 = vector.broadcast %42 : f32 to vector<8x128xf32>
    %448 = arith.mulf %447, %435 : vector<8x128xf32>
    %449 = vector.broadcast %43 : f32 to vector<8x128xf32>
    %450 = arith.mulf %449, %439 : vector<8x128xf32>
    %451 = arith.addf %448, %450 : vector<8x128xf32>
    %452 = vector.broadcast %44 : f32 to vector<8x128xf32>
    %453 = arith.addf %451, %452 : vector<8x128xf32>
    %454 = vector.broadcast %45 : f32 to vector<8x128xf32>
    %455 = arith.mulf %454, %435 : vector<8x128xf32>
    %456 = vector.broadcast %46 : f32 to vector<8x128xf32>
    %457 = arith.mulf %456, %439 : vector<8x128xf32>
    %458 = arith.addf %455, %457 : vector<8x128xf32>
    %459 = vector.broadcast %47 : f32 to vector<8x128xf32>
    %460 = arith.addf %458, %459 : vector<8x128xf32>
    %461 = arith.mulf %89, %460 : vector<8x128xf32>
    %462 = arith.mulf %87, %453 : vector<8x128xf32>
    %463 = arith.subf %461, %462 : vector<8x128xf32>
    %464 = arith.mulf %87, %446 : vector<8x128xf32>
    %465 = arith.mulf %88, %460 : vector<8x128xf32>
    %466 = arith.subf %464, %465 : vector<8x128xf32>
    %467 = arith.mulf %88, %453 : vector<8x128xf32>
    %468 = arith.mulf %89, %446 : vector<8x128xf32>
    %469 = arith.subf %467, %468 : vector<8x128xf32>
    %470 = arith.mulf %453, %469 : vector<8x128xf32>
    %471 = arith.mulf %460, %466 : vector<8x128xf32>
    %472 = arith.subf %470, %471 : vector<8x128xf32>
    %473 = arith.mulf %460, %463 : vector<8x128xf32>
    %474 = arith.mulf %446, %469 : vector<8x128xf32>
    %475 = arith.subf %473, %474 : vector<8x128xf32>
    %476 = arith.mulf %446, %466 : vector<8x128xf32>
    %477 = arith.mulf %453, %463 : vector<8x128xf32>
    %478 = arith.subf %476, %477 : vector<8x128xf32>
    %479 = vector.broadcast %48 : f32 to vector<8x128xf32>
    %480 = arith.mulf %472, %479 : vector<8x128xf32>
    %481 = vector.broadcast %49 : f32 to vector<8x128xf32>
    %482 = arith.mulf %475, %481 : vector<8x128xf32>
    %483 = arith.addf %480, %482 : vector<8x128xf32>
    %484 = vector.broadcast %50 : f32 to vector<8x128xf32>
    %485 = arith.mulf %478, %484 : vector<8x128xf32>
    %486 = arith.addf %483, %485 : vector<8x128xf32>
    %487 = arith.mulf %472, %88 : vector<8x128xf32>
    %488 = arith.mulf %475, %89 : vector<8x128xf32>
    %489 = arith.addf %487, %488 : vector<8x128xf32>
    %490 = arith.mulf %478, %87 : vector<8x128xf32>
    %491 = arith.addf %489, %490 : vector<8x128xf32>
    %492 = tpu.reciprocal %491 {approx = true} : vector<8x128xf32> -> vector<8x128xf32>
    %493 = arith.mulf %491, %492 : vector<8x128xf32>
    %cst_73 = arith.constant 2.000000e+00 : f32
    %494 = vector.broadcast %cst_73 : f32 to vector<8x128xf32>
    %495 = arith.subf %494, %493 : vector<8x128xf32>
    %496 = arith.mulf %492, %495 : vector<8x128xf32>
    %497 = arith.mulf %486, %496 : vector<8x128xf32>
    %498 = arith.mulf %88, %497 : vector<8x128xf32>
    %499 = arith.mulf %89, %497 : vector<8x128xf32>
    %500 = arith.mulf %87, %497 : vector<8x128xf32>
    %501 = vector.broadcast %39 : f32 to vector<8x128xf32>
    %502 = arith.mulf %88, %501 : vector<8x128xf32>
    %503 = vector.broadcast %42 : f32 to vector<8x128xf32>
    %504 = arith.mulf %89, %503 : vector<8x128xf32>
    %505 = arith.addf %502, %504 : vector<8x128xf32>
    %506 = vector.broadcast %45 : f32 to vector<8x128xf32>
    %507 = arith.mulf %87, %506 : vector<8x128xf32>
    %508 = arith.addf %505, %507 : vector<8x128xf32>
    %509 = vector.broadcast %40 : f32 to vector<8x128xf32>
    %510 = arith.mulf %88, %509 : vector<8x128xf32>
    %511 = vector.broadcast %43 : f32 to vector<8x128xf32>
    %512 = arith.mulf %89, %511 : vector<8x128xf32>
    %513 = arith.addf %510, %512 : vector<8x128xf32>
    %514 = vector.broadcast %46 : f32 to vector<8x128xf32>
    %515 = arith.mulf %87, %514 : vector<8x128xf32>
    %516 = arith.addf %513, %515 : vector<8x128xf32>
    %517 = vector.broadcast %41 : f32 to vector<8x128xf32>
    %518 = arith.mulf %88, %517 : vector<8x128xf32>
    %519 = vector.broadcast %44 : f32 to vector<8x128xf32>
    %520 = arith.mulf %89, %519 : vector<8x128xf32>
    %521 = arith.addf %518, %520 : vector<8x128xf32>
    %522 = vector.broadcast %47 : f32 to vector<8x128xf32>
    %523 = arith.mulf %87, %522 : vector<8x128xf32>
    %524 = arith.addf %521, %523 : vector<8x128xf32>
    %525 = vector.broadcast %53 : f32 to vector<8x128xf32>
    %526 = arith.subf %524, %525 : vector<8x128xf32>
    %cst_74 = arith.constant 1.000000e+01 : f32
    %527 = vector.broadcast %cst_74 : f32 to vector<8x128xf32>
    %528 = arith.mulf %527, %524 : vector<8x128xf32>
    %529 = vector.broadcast %53 : f32 to vector<8x128xf32>
    %530 = arith.subf %528, %529 : vector<8x128xf32>
    %531 = arith.mulf %526, %530 : vector<8x128xf32>
    %532 = tpu.reciprocal %531 {approx = true} : vector<8x128xf32> -> vector<8x128xf32>
    %533 = vector.broadcast %53 : f32 to vector<8x128xf32>
    %534 = arith.mulf %508, %533 : vector<8x128xf32>
    %535 = vector.broadcast %51 : f32 to vector<8x128xf32>
    %536 = arith.mulf %535, %524 : vector<8x128xf32>
    %537 = arith.subf %534, %536 : vector<8x128xf32>
    %538 = vector.broadcast %6 : f32 to vector<8x128xf32>
    %539 = arith.mulf %538, %537 : vector<8x128xf32>
    %540 = arith.mulf %539, %532 : vector<8x128xf32>
    %541 = vector.broadcast %53 : f32 to vector<8x128xf32>
    %542 = arith.mulf %516, %541 : vector<8x128xf32>
    %543 = vector.broadcast %52 : f32 to vector<8x128xf32>
    %544 = arith.mulf %543, %524 : vector<8x128xf32>
    %545 = arith.subf %542, %544 : vector<8x128xf32>
    %546 = vector.broadcast %7 : f32 to vector<8x128xf32>
    %547 = arith.mulf %546, %545 : vector<8x128xf32>
    %548 = arith.mulf %547, %532 : vector<8x128xf32>
    %549 = arith.mulf %540, %540 : vector<8x128xf32>
    %550 = arith.mulf %548, %548 : vector<8x128xf32>
    %551 = arith.addf %549, %550 : vector<8x128xf32>
    %552 = arith.mulf %497, %524 : vector<8x128xf32>
    %553 = vector.broadcast %53 : f32 to vector<8x128xf32>
    %554 = arith.subf %552, %553 : vector<8x128xf32>
    %555 = tpu.reciprocal %554 {approx = true} : vector<8x128xf32> -> vector<8x128xf32>
    %556 = arith.mulf %497, %508 : vector<8x128xf32>
    %557 = vector.broadcast %51 : f32 to vector<8x128xf32>
    %558 = arith.subf %556, %557 : vector<8x128xf32>
    %559 = arith.mulf %558, %555 : vector<8x128xf32>
    %560 = vector.broadcast %0 : f32 to vector<8x128xf32>
    %561 = arith.mulf %559, %560 : vector<8x128xf32>
    %562 = vector.broadcast %2 : f32 to vector<8x128xf32>
    %563 = arith.addf %561, %562 : vector<8x128xf32>
    %564 = arith.mulf %497, %516 : vector<8x128xf32>
    %565 = vector.broadcast %52 : f32 to vector<8x128xf32>
    %566 = arith.subf %564, %565 : vector<8x128xf32>
    %567 = arith.mulf %566, %555 : vector<8x128xf32>
    %568 = vector.broadcast %1 : f32 to vector<8x128xf32>
    %569 = arith.mulf %567, %568 : vector<8x128xf32>
    %570 = vector.broadcast %3 : f32 to vector<8x128xf32>
    %571 = arith.addf %569, %570 : vector<8x128xf32>
    %572 = arith.subf %563, %428 : vector<8x128xf32>
    %573 = arith.subf %571, %431 : vector<8x128xf32>
    %574 = arith.mulf %572, %572 : vector<8x128xf32>
    %575 = arith.mulf %573, %573 : vector<8x128xf32>
    %576 = arith.addf %574, %575 : vector<8x128xf32>
    %cst_75 = arith.constant 9.99999997E-7 : f32
    %577 = vector.broadcast %cst_75 : f32 to vector<8x128xf32>
    %578 = arith.cmpf ogt, %500, %577 : vector<8x128xf32>
    %579 = arith.cmpf ogt, %551, %425 : vector<8x128xf32>
    %580 = arith.andi %578, %579 : vector<8x128xi1>
    %581 = vector.broadcast %8 : f32 to vector<8x128xf32>
    %582 = arith.cmpf olt, %576, %581 : vector<8x128xf32>
    %583 = arith.andi %580, %582 : vector<8x128xi1>
    %584 = arith.minimumf %428, %431 : vector<8x128xf32>
    %cst_76 = arith.constant 0.000000e+00 : f32
    %585 = vector.broadcast %cst_76 : f32 to vector<8x128xf32>
    %586 = arith.cmpf ogt, %584, %585 : vector<8x128xf32>
    %587 = arith.andi %583, %586 : vector<8x128xi1>
    %588 = arith.select %587, %498, %422 : vector<8x128xi1>, vector<8x128xf32>
    %589 = arith.select %587, %499, %423 : vector<8x128xi1>, vector<8x128xf32>
    %590 = arith.select %587, %500, %424 : vector<8x128xi1>, vector<8x128xf32>
    %591 = arith.select %587, %551, %425 : vector<8x128xi1>, vector<8x128xf32>
    %592 = vector.broadcast %63 : f32 to vector<8x128xf32>
    %593 = arith.subf %588, %592 : vector<8x128xf32>
    %594 = vector.broadcast %64 : f32 to vector<8x128xf32>
    %595 = arith.subf %589, %594 : vector<8x128xf32>
    %596 = vector.broadcast %65 : f32 to vector<8x128xf32>
    %597 = arith.subf %590, %596 : vector<8x128xf32>
    %598 = vector.broadcast %54 : f32 to vector<8x128xf32>
    %599 = arith.mulf %593, %598 : vector<8x128xf32>
    %600 = vector.broadcast %57 : f32 to vector<8x128xf32>
    %601 = arith.mulf %595, %600 : vector<8x128xf32>
    %602 = arith.addf %599, %601 : vector<8x128xf32>
    %603 = vector.broadcast %60 : f32 to vector<8x128xf32>
    %604 = arith.mulf %597, %603 : vector<8x128xf32>
    %605 = arith.addf %602, %604 : vector<8x128xf32>
    %c0_77 = arith.constant 0 : index
    %606 = arith.index_cast %67 : i32 to index
    %c0_78 = arith.constant 0 : index
    %607 = vector.load %arg10[%c0_77, %606, %c0_78] : memref<3x8x128xf32, #tpu.memory_space<vmem>>, vector<1x8x128xf32>
    %608 = vector.shape_cast %607 : vector<1x8x128xf32> to vector<8x128xf32>
    %609 = vector.shape_cast %605 : vector<8x128xf32> to vector<1x8x128xf32>
    tpu.vector_store %arg10[%c0_77, %606, %c0_78], %609 {strides = array<i32>} : memref<3x8x128xf32, #tpu.memory_space<vmem>>, vector<1x8x128xf32>,
    %610 = vector.broadcast %55 : f32 to vector<8x128xf32>
    %611 = arith.mulf %593, %610 : vector<8x128xf32>
    %612 = vector.broadcast %58 : f32 to vector<8x128xf32>
    %613 = arith.mulf %595, %612 : vector<8x128xf32>
    %614 = arith.addf %611, %613 : vector<8x128xf32>
    %615 = vector.broadcast %61 : f32 to vector<8x128xf32>
    %616 = arith.mulf %597, %615 : vector<8x128xf32>
    %617 = arith.addf %614, %616 : vector<8x128xf32>
    %c1_79 = arith.constant 1 : index
    %618 = arith.index_cast %67 : i32 to index
    %c0_80 = arith.constant 0 : index
    %619 = vector.load %arg10[%c1_79, %618, %c0_80] : memref<3x8x128xf32, #tpu.memory_space<vmem>>, vector<1x8x128xf32>
    %620 = vector.shape_cast %619 : vector<1x8x128xf32> to vector<8x128xf32>
    %621 = vector.shape_cast %617 : vector<8x128xf32> to vector<1x8x128xf32>
    tpu.vector_store %arg10[%c1_79, %618, %c0_80], %621 {strides = array<i32>} : memref<3x8x128xf32, #tpu.memory_space<vmem>>, vector<1x8x128xf32>,
    %622 = vector.broadcast %56 : f32 to vector<8x128xf32>
    %623 = arith.mulf %593, %622 : vector<8x128xf32>
    %624 = vector.broadcast %59 : f32 to vector<8x128xf32>
    %625 = arith.mulf %595, %624 : vector<8x128xf32>
    %626 = arith.addf %623, %625 : vector<8x128xf32>
    %627 = vector.broadcast %62 : f32 to vector<8x128xf32>
    %628 = arith.mulf %597, %627 : vector<8x128xf32>
    %629 = arith.addf %626, %628 : vector<8x128xf32>
    %c2_81 = arith.constant 2 : index
    %630 = arith.index_cast %67 : i32 to index
    %c0_82 = arith.constant 0 : index
    %631 = vector.load %arg10[%c2_81, %630, %c0_82] : memref<3x8x128xf32, #tpu.memory_space<vmem>>, vector<1x8x128xf32>
    %632 = vector.shape_cast %631 : vector<1x8x128xf32> to vector<8x128xf32>
    %633 = vector.shape_cast %629 : vector<8x128xf32> to vector<1x8x128xf32>
    tpu.vector_store %arg10[%c2_81, %630, %c0_82], %633 {strides = array<i32>} : memref<3x8x128xf32, #tpu.memory_space<vmem>>, vector<1x8x128xf32>,
    %634 = arith.index_cast %67 : i32 to index
    %c0_83 = arith.constant 0 : index
    %635 = vector.load %arg11[%634, %c0_83] : memref<8x128xf32, #tpu.memory_space<vmem>>, vector<8x128xf32>
    tpu.vector_store %arg11[%634, %c0_83], %590 {strides = array<i32>} : memref<8x128xf32, #tpu.memory_space<vmem>>, vector<8x128xf32>,
    %636 = math.sqrt %591 : vector<8x128xf32>
    %637 = arith.index_cast %67 : i32 to index
    %c0_84 = arith.constant 0 : index
    %638 = vector.load %arg12[%637, %c0_84] : memref<8x128xf32, #tpu.memory_space<vmem>>, vector<8x128xf32>
    tpu.vector_store %arg12[%637, %c0_84], %636 {strides = array<i32>} : memref<8x128xf32, #tpu.memory_space<vmem>>, vector<8x128xf32>,
    %c1_i32 = arith.constant 1 : i32
    return
  }
  func.func @transform_0(%arg0: i32) -> (i32, i32, i32) {
    %c0_i32 = arith.constant 0 : i32
    %c0_i32_0 = arith.constant 0 : i32
    %c0_i32_1 = arith.constant 0 : i32
    return %c0_i32, %arg0, %c0_i32_0 : i32, i32, i32
  }
  func.func @transform_1(%arg0: i32) -> (i32, i32, i32, i32) {
    %c0_i32 = arith.constant 0 : i32
    %c0_i32_0 = arith.constant 0 : i32
    %c0_i32_1 = arith.constant 0 : i32
    %c0_i32_2 = arith.constant 0 : i32
    return %c0_i32, %c0_i32_0, %arg0, %c0_i32_1 : i32, i32, i32, i32
  }
  func.func @transform_2(%arg0: i32) -> i32 {
    %c0_i32 = arith.constant 0 : i32
    %c0_i32_0 = arith.constant 0 : i32
    return %c0_i32 : i32
  }
  func.func @transform_3(%arg0: i32) -> i32 {
    %c0_i32 = arith.constant 0 : i32
    %c0_i32_0 = arith.constant 0 : i32
    return %c0_i32 : i32
  }
  func.func @transform_4(%arg0: i32) -> i32 {
    %c0_i32 = arith.constant 0 : i32
    %c0_i32_0 = arith.constant 0 : i32
    return %c0_i32 : i32
  }
  func.func @transform_5(%arg0: i32) -> i32 {
    %c0_i32 = arith.constant 0 : i32
    %c0_i32_0 = arith.constant 0 : i32
    return %c0_i32 : i32
  }
  func.func @transform_6(%arg0: i32) -> i32 {
    %c0_i32 = arith.constant 0 : i32
    %c0_i32_0 = arith.constant 0 : i32
    return %c0_i32 : i32
  }
  func.func @transform_7(%arg0: i32) -> i32 {
    %c0_i32 = arith.constant 0 : i32
    %c0_i32_0 = arith.constant 0 : i32
    return %c0_i32 : i32
  }
  func.func @transform_8(%arg0: i32) -> i32 {
    %c0_i32 = arith.constant 0 : i32
    %c0_i32_0 = arith.constant 0 : i32
    return %c0_i32 : i32
  }
  func.func @transform_9(%arg0: i32) -> (i32, i32, i32) {
    %c0_i32 = arith.constant 0 : i32
    %c0_i32_0 = arith.constant 0 : i32
    %c0_i32_1 = arith.constant 0 : i32
    return %c0_i32, %arg0, %c0_i32_0 : i32, i32, i32
  }
  func.func @transform_10(%arg0: i32) -> (i32, i32) {
    %c0_i32 = arith.constant 0 : i32
    %c0_i32_0 = arith.constant 0 : i32
    return %arg0, %c0_i32 : i32, i32
  }
  func.func @transform_11(%arg0: i32) -> (i32, i32) {
    %c0_i32 = arith.constant 0 : i32
    %c0_i32_0 = arith.constant 0 : i32
    return %arg0, %c0_i32 : i32, i32
  }
}

</mosaic_0001>

<bundles_post_ra>
// kernel: custom-call.11
= control target key start
LH: loop header
LB: loop body
LE: loop exit
PB: predicated region body
PF: predicated region fallthrough
CT: control target
= control target key end

     0   :  { %5 = vsyncpa [#allocation2], 0  ;;  %s942_s0 = inlined_call_operand.hbm [shape: f32[3,4,4], index: 0, kind: input, shape index: {}]   ;;  %s943_s1 = inlined_call_operand.vmem [shape: f32[3,4,4], index: 1, kind: output, shape index: {0}]   ;;  %s944_s2 = inlined_call_operand.hbm [shape: s32[3,4], index: 2, kind: output, shape index: {1}]   ;;  %s945_s3 = inlined_call_operand.vmem [shape: s32[3,4], index: 3, kind: output, shape index: {2}]  }
   0x1   :  { %7 = vsyncpa [#allocation2 + $0x1], 0 }
   0x2   :  { %8 = vsyncpa [#allocation3], 0 }
   0x3   :  { %10 = vsyncpa [#allocation3 + $0x1], 0  ;;  %s735_s12 = smov 0   ;;  %s737_s13 = smov 0  }
   0x4   :  { %s739_s14 = smov 0   ;;  %s741_s15 = smov 0  }
   0x5 LB: > { %s756_s16 = sadd.s32 4294967295, %s706_s15   ;;  %s536_s17 = sadd.s32 4294967294, %s706_s15   ;;  %s706_s15 = sphi %s741_s15, %s956_s15   ;;  %s702_s14 = sphi %s739_s14, %s955_s14   ;;  %s698_s13 = sphi %s737_s13, %s954_s13   ;;  %s694_s12 = sphi %s735_s12, %s953_s12  }
   0x6   : > { %s760_s18 = sadd.s32 1, %s706_s15   ;;  %s20_s19 = sshrl.u32 %s706_s15, 3 }
   0x7   : > { %s21_s20 = sshrl.u32 %s760_s18, 3  ;;  %s25_s21 = sadd.s32 1, %s702_s14 }
   0x8   : > { %s22_s22 = ssub.s32 %s20_s19, %s21_s20  ;;  %p35_p0 = scmp.ne.s32.totalorder %s702_s14, %s698_s13 }
   0x9   : > { %p23_p1 = scmp.eq.s32.totalorder %s22_s22, 0  ;;  %p36_p2 = scmp.eq.s32.totalorder %s756_s16, 2 }
   0xa   : > { %p41_p3 = scmp.ne.s32.totalorder %s698_s13, %s694_s12  ;;  %p42_p4 = scmp.eq.s32.totalorder %s536_s17, 2 }
   0xb   : > { %s771_s23 = scalar_select %p23_p1, %s702_s14, %s25_s21  }
   0xc   : > { %p773_p5 = por %p36_p2, %p35_p0  ;;  %p777_p6 = por %p42_p4, %p41_p3 }
   0xd   : > { %p565_p7 = scmp.lt.s32.totalorder %s706_s15, 3  ;;  %s87_s26 = sand.u32 1, %s706_s15  }
   0xe   : > { %s948_s25 = scalar_select %p777_p6, 1, 0 }
   0xf   : > { %s540_s27 = sshll.u32 %s706_s15, 6  ;;  %s539_s28 = sshll.u32 %s87_s26, 2 }
  0x10   : > { %s787_s4 = scalar_lea.hbm %s942_s0, %s540_s27  ;;  %s91_s5 = scalar_lea.vmem [#allocation1], %s539_s28 }
  0x11   : > { %s98_s6 = sshll.u32 %s91_s5, 4  ;;  %s88_s7 = scalar_lea.sflag [#allocation2], %s87_s26  ;;  %s790_s6 = int_to_ptr.vmem [resolvable:$true] %s98_s6 }
  0x12   : > { %s610_s8 = scalar_lea.hbm %s787_s4, 64  ;;  %s614_s11 = scalar_lea.hbm %s942_s0, 192 }
  0x13   : > { %p611_p10 = scmp.ne.s32.totalorder %s787_s4, %s610_s8  ;;  %p615_p13 = scmp.lt.u32.totalorder %s787_s4, %s942_s0 }
  0x14   : > { %p616_p0 = scmp.lt.u32.totalorder %s614_s11, %s610_s8  ;;  %p618_p2 = scmp.lt.u32.totalorder %s610_s8, %s787_s4 }
  0x15   : > { %p612_p11 = pnand %p611_p10, %p565_p7 }
  0x16   : > { %p617_p1 = por %p616_p0, %p615_p13 }
  0x17   : > { %p613_p12 = pneg %p612_p11 }
  0x18   : > { %p619_p3 = por %p618_p2, %p617_p1 }
  0x1a   : > { %p620_p4 = pnand %p619_p3, %p613_p12 }
  0x1c   : > { %623 = shalt.err (!%p620_p4)
}
  0x1d   : > { %s624_s20 = scalar_lea.vmem %s790_s6, 64  ;;  %s712_s21 = smov [#allocation1]  }
  0x1e   : > { %p625_p10 = scmp.ne.s32.totalorder %s790_s6, %s624_s20  ;;  %s628_s22 = sshll.u32 %s712_s21, 4  ;;  %s629_s22 = int_to_ptr.vmem [resolvable:$false] %s628_s22 }
  0x1f   : > { %s630_s26 = scalar_lea.vmem %s629_s22, 128  ;;  %p631_p9 = scmp.lt.s32.totalorder %s790_s6, %s629_s22 }
  0x20   : > { %p626_p11 = pnand %p625_p10, %p565_p7  ;;  %p632_p6 = scmp.lt.s32.totalorder %s630_s26, %s624_s20 }
  0x22   : > { %p627_p8 = pneg %p626_p11  ;;  %p633_p13 = por %p632_p6, %p631_p9 }
  0x24   : > { %p634_p0 = pnand %p633_p13, %p627_p8 }
  0x26   : > { %637 = shalt.err (!%p634_p0)
}
  0x27   : > { %558 = dma.hbm_to_vmem [thread:$0]  (%p565_p7), %s787_s4, 64, %s790_s6, %s88_s7  }
  0x28   : > { %p949_p12 = scmp.lt.s32.totalorder %s706_s15, 4  ;;  %p950_p1 = scmp.ge.s32.totalorder %s706_s15, 1 }
  0x2a   : > { %p104_p2 = pnand %p950_p1, %p949_p12 }
  0x2c   : > { %107 = sbr.rel (%p104_p2) target bundleno = 474 (0x1da), region = 20 }
  0x33   : > { %s109_s27 = sand.u32 1, %s756_s16  }
  0x34   : > { %s110_s28 = scalar_lea.sflag [#allocation2], %s109_s27 }
  0x35   : > { %686 = dma.done.wait %s110_s28, 64  }
  0x36   : > { %687 = vsyncadd %s110_s28, 4294967232  ;;  %s819_s29 = sshll.u32 %s109_s27, 2  ;;  %s145_s30 = sand.u32 7, %s756_s16   ;;  %v150_v0 = vlaneseq  ;;  %v713_v2 = vmov 0  }
  0x37   : > { %s825_s4 = scalar_lea.vmem [#allocation6], %s145_s30  ;;  %s128_s5 = sand.u32 1, %s698_s13  }
  0x38   : > { %v823_v1 = vshrl.u32 %v150_v0, 7  ;;  %149 = vst [vmem:[%s825_s4] sm:$0x1] %v713_v2  ;;  %s832_s6 = sshll.u32 %s128_s5, 2  ;;  %s119_s7 = scalar_lea.vmem [#allocation1], %s819_s29 }
  0x39   : > { %v139_v3 = vld [vmem:[%s119_s7] sm:$0xf]  ;;  %s123_s8 = scalar_lea.vmem [#allocation5], %s819_s29  ;;  %s130_s9 = scalar_lea.vmem [#allocation7], %s832_s6 }
  0x3a   : > { %154 = vst [vmem:[#allocation10] sm:$0xff] %v823_v1  ;;  %140 = vst [vmem:[#allocation0] sm:$0xf] %v139_v3  ;;  %s136_s10 = scalar_lea.vmem [#allocation9], %s832_s6  ;;  %s838_s11 = scalar_lea.vmem [#allocation8], %s145_s30 }
  0x3b   : > { %s840_s17 = smov 0  }
  0x41   : > { %v143_v4 = vld [vmem:[#allocation0] sm:$0xff] }
  0x42   : > { %144 = vst [vmem:[#allocation4] sm:$0xff] %v143_v4 }
  0x43 LB: >> { %vm170_vm0 = vcmp.lt.s32.totalorder %v823_v1, 4  ;;  %v847_v7 = vstv %s710_s17  ;;  %s211_s19 = ssub.s32 128, %s710_s17  ;;  %v217_v37 = vand.u32 127, %v150_v0  ;;  %v220_v39 = vld [vmem:[%s825_s4] ss:$0 sm:$0xff]  ;;  %s223_s20 = scalar_lea.vmem [#allocation4], %s710_s17  ;;  %s710_s17 = sphi %s840_s17, %s160_s17  }
  0x44   : >> { %vm169_vm1 = vcmp.ge.s32.totalorder %v823_v1, %v847_v7  ;;  %s229_s22 = scalar_lea.vmem [#allocation10], %s710_s17  ;;  %vm249_vm15 = vcmp.gt.s32.totalorder %v823_v1, %v847_v7  ;;  %s160_s17 = sadd.s32 1, %s710_s17  }
  0x45   : >> { %vm171_vm3 = vmand %vm169_vm1, %vm170_vm0  ;;  %vm241_vm12 = vcmp.gt.s32.totalorder %v217_v37, %v847_v7  ;;  %vm218_vm13 = vcmp.eq.s32.totalorder %v217_v37, %v847_v7  ;;  %v231_v41 = vld [vmem:[%s229_s22] ss:$0 sm:$0xff]  ;;  %p157_p6 = scmp.ge.s32.totalorder %s160_s17, 4  }
  0x46   : >> { %vm253_vm1 = vmand %vm249_vm15, %vm218_vm13  ;;  %s946_s28 = sshrl.u32 (%p157_p6), %s756_s16, 3  ;;  %s550_s30 = sshll.u32 (%p157_p6), %s756_s16, 2 }
  0x47   : > { %s551_s7 = sshll.u32 (%p157_p6), %s946_s28, 6 }
  0x49   : >> { %v165_v5 = vld [vmem:[#allocation4] sm:$0xff]  ;;  %v225_v40 = vld [vmem:[%s223_s20] ss:$0 sm:$0xff] }
  0x4a   : >> { %v166_v6 = vand.u32 2147483647, %v165_v5 }
  0x4c   : >> { %vm546_vm2 = vcmp.gt.f32.partialorder %v166_v6, -inf }
  0x4d   : >> { %vm173_vm4 = vmand %vm171_vm3, %vm546_vm2 }
  0x4e   : >> { %v174_v8 = vsel %vm173_vm4, %v823_v1, %v847_v7  ;;  %v175_v9 = vsel %vm173_vm4, %v166_v6, -inf }
  0x4f   : >> { %v176_v10 = vrot.slane %v175_v9, 1  ;;  %v177_v11 = vrot.slane %v174_v8, 1 }
  0x51   : >> { %vm178_vm5 = vcmp.ge.f32.partialorder %v176_v10, %v175_v9  ;;  %v181_v12 = vrot.slane %v176_v10, 1  ;;  %v182_v13 = vrot.slane %v177_v11, 1 }
  0x52   : >> { %v179_v14 = vsel %vm178_vm5, %v176_v10, %v175_v9  ;;  %v180_v15 = vsel %vm178_vm5, %v177_v11, %v174_v8 }
  0x53   : >> { %vm183_vm6 = vcmp.ge.f32.partialorder %v181_v12, %v179_v14  ;;  %v186_v16 = vrot.slane %v181_v12, 1  ;;  %v187_v17 = vrot.slane %v182_v13, 1 }
  0x54   : >> { %v184_v18 = vsel %vm183_vm6, %v181_v12, %v179_v14  ;;  %v185_v19 = vsel %vm183_vm6, %v182_v13, %v180_v15 }
  0x55   : >> { %vm188_vm7 = vcmp.ge.f32.partialorder %v186_v16, %v184_v18  ;;  %v191_v20 = vrot.slane %v186_v16, 1  ;;  %v192_v21 = vrot.slane %v187_v17, 1 }
  0x56   : >> { %v189_v22 = vsel %vm188_vm7, %v186_v16, %v184_v18  ;;  %v190_v23 = vsel %vm188_vm7, %v187_v17, %v185_v19 }
  0x57   : >> { %vm193_vm8 = vcmp.ge.f32.partialorder %v191_v20, %v189_v22  ;;  %v196_v24 = vrot.slane %v191_v20, 1  ;;  %v197_v25 = vrot.slane %v192_v21, 1 }
  0x58   : >> { %v194_v26 = vsel %vm193_vm8, %v191_v20, %v189_v22  ;;  %v195_v27 = vsel %vm193_vm8, %v192_v21, %v190_v23 }
  0x59   : >> { %vm198_vm9 = vcmp.ge.f32.partialorder %v196_v24, %v194_v26  ;;  %v201_v28 = vrot.slane %v196_v24, 1  ;;  %v202_v29 = vrot.slane %v197_v25, 1 }
  0x5a   : >> { %v199_v30 = vsel %vm198_vm9, %v196_v24, %v194_v26  ;;  %v200_v31 = vsel %vm198_vm9, %v197_v25, %v195_v27 }
  0x5b   : >> { %vm203_vm10 = vcmp.ge.f32.partialorder %v201_v28, %v199_v30  ;;  %v206_v32 = vrot.slane %v201_v28, 1  ;;  %v207_v33 = vrot.slane %v202_v29, 1 }
  0x5c   : >> { %v204_v34 = vsel %vm203_vm10, %v201_v28, %v199_v30  ;;  %v205_v35 = vsel %vm203_vm10, %v202_v29, %v200_v31 }
  0x5d   : >> { %vm208_vm11 = vcmp.ge.f32.partialorder %v206_v32, %v204_v34 }
  0x5e   : >> { %v210_v36 = vsel %vm208_vm11, %v207_v33, %v205_v35 }
  0x5f   : >> { %212 = vrot.lane.b32.xlu0 %v210_v36, %s211_s19  ;;  %s341_s19 = scalar_lea.vmem (%p157_p6), %s943_s1, %s550_s30 }
  0xd1   : >> { %v213_v38 = vpop.permute.xlu0 %212 }
  0xd2   : >> { %555 = vpush %v213_v38 }
 0x103   : >> { %s556_s21 = spop %555 }
 0x104   : >> { %v219_v42 = vstv %s556_s21  ;;  %s224_s26 = scalar_lea.vmem [#allocation4], %s556_s21  ;;  %s230_s27 = scalar_lea.vmem [#allocation10], %s556_s21 }
 0x105   : >> { %v226_v43 = vld [vmem:[%s224_s26] ss:$0 sm:$0xff]  ;;  %v221_v45 = vsel %vm218_vm13, %v219_v42, %v220_v39 }
 0x106   : >> { %v232_v44 = vld [vmem:[%s230_s27] ss:$0 sm:$0xff]  ;;  %227 = vst [vmem:[%s224_s26] sm:$0x1] %v225_v40  ;;  %vm235_vm14 = vcmp.ne.f32.partialorder %v226_v43, 0.0  ;;  %222 = vst [vmem:[%s825_s4] sm:$0x1] %v221_v45  ;;  %v242_v52 = vsel %vm241_vm12, %v226_v43, 0.0 }
 0x107   : >> { %233 = vst [vmem:[%s230_s27] sm:$0x1] %v231_v41  ;;  %228 = vst [vmem:[%s223_s20] sm:$0x1] %v226_v43  ;;  %s383_s26 = sshll.u32 (%p157_p6), %s130_s9, 4  ;;  %s332_s27 = scalar_lea.sflag (%p157_p6), [#allocation3], %s128_s5  ;;  %s384_s26 = int_to_ptr.vmem [resolvable:$true] %s383_s26 }
 0x108   : >> { %234 = vst [vmem:[%s229_s22] sm:$0x1] %v232_v44  ;;  %vm236_vm0 = vmand %vm218_vm13, %vm235_vm14  ;;  %s890_s22 = scalar_lea.hbm (%p157_p6), %s944_s2, %s551_s7  ;;  %s638_s28 = scalar_lea.vmem (%p157_p6), %s384_s26, 64 }
 0x109   : >> { %v237_v46 = vsel %vm236_vm0, %v226_v43, 1.0  ;;  %p639_p7 = scmp.ne.s32.totalorder (%p157_p6), %s384_s26, %s638_s28  ;;  %s714_s4 = smov (%p157_p6), [#allocation7]  }
 0x10a   : >> { %v250_v47 = vsel %vm249_vm15, %v237_v46, 1.0  ;;  %s642_s30 = sshll.u32 (%p157_p6), %s714_s4, 4  ;;  %s643_s30 = int_to_ptr.vmem [resolvable:$false] %s642_s30 }
 0x10b   : >> { %608 = vrcp.f32 %v250_v47  ;;  %p640_p8 = pnand (%p157_p6), %p639_p7, %p773_p5  ;;  %s644_s29 = scalar_lea.vmem (%p157_p6), %s643_s30, 128 }
 0x10c   : > { %p645_p3 = scmp.lt.s32.totalorder (%p157_p6), %s384_s26, %s643_s30  ;;  %p646_p4 = scmp.lt.s32.totalorder (%p157_p6), %s644_s29, %s638_s28 }
 0x10d   : > { %v318_v58 = vld [vmem:[#allocation6] sm:$0xf] (%p157_p6)  ;;  %p641_p9 = pneg (%p157_p6), %p640_p8 }
 0x10e   : >> { %v246_v49 = vld [vmem:[#allocation4] sm:$0xff]  ;;  %320 = vst [vmem:[%s130_s9] sm:$0xf] (%p157_p6), %v318_v58  ;;  %p647_p10 = por (%p157_p6), %p646_p4, %p645_p3 }
 0x10f   : > { %v260_v56 = vld [vmem:[#allocation10] sm:$0xff] (%p157_p6) }
 0x110   : > { %p648_p11 = pnand (%p157_p6), %p647_p10, %p641_p9 }
 0x115   : >> { %v609_v48 = vpop.eup %608 }
 0x116   : >> { %v252_v50 = vmul.f32 %v609_v48, %v246_v49 }
 0x118   : >> { %v254_v51 = vsel %vm253_vm1, %v252_v50, 0.0 }
 0x119   : >> { %255 = vadd.xlane.f32.xlu0 %v254_v51 }
 0x146   : > { %276 = vxpose.xlu0.b32.start.end [1/1] (short) (narrow) (%p157_p6), %v260_v56, 8 }
 0x1a5   : > { %159 = sbr.rel (!%p157_p6) target bundleno = 67 (0x43), region = 173 }
 0x1a6   : >> { %v256_v53 = vpop.xlane.xlu0 %255 }
 0x1a7   : >> { %v257_v54 = vmul.f32 %v256_v53, %v242_v52 }
 0x1a9   : >> { %v258_v55 = vsub.f32 %v252_v50, %v257_v54 }
 0x1ab   : >> { %259 = vst [vmem:[#allocation4] sm:$0xff] %v258_v55 }
 0x1b2   : > { %v312_v57 = vld [vmem:[#allocation4] sm:$0xf] }
 0x1b3   : > { %314 = vst [vmem:[%s123_s8] sm:$0xf] %v312_v57 }
 0x1ba   : > { %v357_v59 = vld [vmem:[%s123_s8] sm:$0xf] }
 0x1bb   : > { %358 = vst [vmem:[%s341_s19] sm:$0xf] %v357_v59 }
 0x1bc   : > { %651 = shalt.err (!%p648_p11)
}
 0x1bd   : > { %s652_s5 = scalar_lea.hbm %s890_s22, 64  ;;  %s656_s7 = scalar_lea.hbm %s944_s2, 64 }
 0x1be   : > { %p653_p13 = scmp.ne.s32.totalorder %s890_s22, %s652_s5  ;;  %p657_p1 = scmp.lt.u32.totalorder %s890_s22, %s944_s2 }
 0x1bf   : > { %p658_p2 = scmp.lt.u32.totalorder %s656_s7, %s652_s5  ;;  %p660_p7 = scmp.lt.u32.totalorder %s652_s5, %s890_s22 }
 0x1c0   : > { %p654_p0 = pnand %p653_p13, %p773_p5 }
 0x1c1   : > { %p659_p6 = por %p658_p2, %p657_p1 }
 0x1c2   : > { %p655_p12 = pneg %p654_p0 }
 0x1c3   : > { %p661_p8 = por %p660_p7, %p659_p6 }
 0x1c5   : > { %p662_p9 = pnand %p661_p8, %p655_p12 }
 0x1c7   : > { %665 = shalt.err (!%p662_p9)
}
 0x1c8   : > { %559 = dma.vmem_to_hbm [thread:$0]  (%p773_p5), %s384_s26, 64, %s890_s22, %s332_s27   ;;  %v292_v60 = vpop.trf.xlu0 }
 0x1c9   : > { %308 = vst [vmem:[%s838_s11] sm:$0x1] %v292_v60  ;;  %s951_s28 = sshrl.u32 (%p773_p5), %s756_s16, 3 }
 0x1ca   : > { %s552_s20 = sshll.u32 (%p773_p5), %s951_s28, 2 }
 0x1cb   : > { %389 = sbr.rel (!%p773_p5) target bundleno = 474 (0x1da), region = 66  ;;  %s392_s30 = scalar_lea.vmem (%p773_p5), %s945_s3, %s552_s20 }
 0x1d0   : > { %v324_v61 = vld [vmem:[#allocation8] sm:$0xf] }
 0x1d1   : > { %326 = vst [vmem:[%s136_s10] sm:$0xf] %v324_v61 }
 0x1d8   : > { %v408_v62 = vld [vmem:[%s136_s10] sm:$0xf] }
 0x1d9   : > { %409 = vst [vmem:[%s392_s30] sm:$0xf] %v408_v62 }
 0x1da PF: > { %p566_p3 = scmp.ge.s32.totalorder %s706_s15, 2  ;;  %s436_s11 = sand.u32 1, %s694_s12  }
 0x1db   : > { %p952_p4 = scmp.ne.s32.totalorder %s948_s25, 0  ;;  %s437_s24 = scalar_lea.sflag [#allocation3], %s436_s11 }
 0x1dd   : > { %p562_p5 = pnand %p566_p3, %p952_p4 }
 0x1df   : > { %689 = dma.done.wait (!%p562_p5), %s437_s24, 64  }
 0x1e0   : > { %691 = vsyncadd (!%p562_p5), %s437_s24, 4294967232  ;;  %p13_p10 = scmp.ge.s32.totalorder %s760_s18, 5   ;;  %s953_s12 = smov %s698_s13 }
 0x1e1   : > { %s954_s13 = smov %s702_s14  ;;  %s955_s14 = smov %s771_s23 }
 0x1e2   : > { %s956_s15 = smov %s760_s18  ;;  %15 = sbr.rel (!%p13_p10) target bundleno = 5 (0x5), region = 184 }
 0x1e9   :  { %449 = vsyncpa [#allocation2], 1 }
 0x1ea   :  { %451 = vsyncpa [#allocation2 + $0x1], 1 }
 0x1eb   :  { %452 = vsyncpa [#allocation3], 1 }
 0x1ec   :  { %454 = vsyncpa [#allocation3 + $0x1], 1 }

// kernel: custom-call.13
= control target key start
LH: loop header
LB: loop body
LE: loop exit
PB: predicated region body
PF: predicated region fallthrough
CT: control target
= control target key end

     0   :  { %s353_s6 = smov 0   ;;  %s355_s7 = smov 0   ;;  %s400_s0 = inlined_call_operand.vmem [shape: f32[3,1,4,4], index: 0, kind: input, shape index: {}]   ;;  %s401_s1 = inlined_call_operand.vmem [shape: f32[3,1,4,4], index: 1, kind: output, shape index: {}]  }
   0x1   :  { %s357_s8 = smov 0  }
   0x2 LB: > { %s279_s9 = sadd.s32 4294967295, %s340_s8   ;;  %s33_s10 = sadd.s32 1, %s336_s7  ;;  %s340_s8 = sphi %s357_s8, %s7_s8   ;;  %s336_s7 = sphi %s355_s7, %s403_s7   ;;  %s332_s6 = sphi %s353_s6, %s402_s6  }
   0x3   : > { %p35_p0 = scmp.ge.s32.totalorder %s33_s10, 3  ;;  %p281_p1 = scmp.ge.s32.totalorder %s340_s8, 3 }
   0x4   : > { %s49_s11 = sand.u32 (!%p281_p1), 1, %s340_s8   ;;  %s283_s12 = sshll.u32 (!%p281_p1), %s336_s7, 2 }
   0x5   : > { %s405_s10 = smov (%p35_p0, %s33_s10), 0  ;;  %47 = sbr.rel (%p281_p1) target bundleno = 12 (0xc), region = 16 }
   0x6   : > { %s282_s13 = sshll.u32 (!%p281_p1), %s49_s11, 2  ;;  %s56_s16 = scalar_lea.vmem (!%p281_p1), %s400_s0, %s283_s12 }
   0x7   : > { %v72_v0 = vld [vmem:[%s56_s16] sm:$0xf] (!%p281_p1)  ;;  %s51_s17 = scalar_lea.vmem (!%p281_p1), [#allocation1], %s282_s13 }
   0x8   : > { %73 = vst [vmem:[%s51_s17] sm:$0xf] (!%p281_p1), %v72_v0 }
   0xc PF: > { %p284_p2 = scmp.ge.s32.totalorder %s340_s8, 1  ;;  %p89_p3 = scmp.lt.s32.totalorder %s340_s8, 4 }
   0xe   : > { %p90_p4 = pnand %p284_p2, %p89_p3 }
  0x10   : > { %93 = sbr.rel (%p90_p4) target bundleno = 656 (0x290), region = 50 }
  0x17   : > { %s380_s18 = sand.u32 1, %s279_s9   ;;  %v111_v1 = vlaneseq  ;;  %v342_v11 = vmov -1.0   ;;  %s288_s22 = sshll.u32 %s332_s6, 2 }
  0x18   : > { %s285_s19 = sshll.u32 %s380_s18, 2  ;;  %s188_s25 = scalar_lea.vmem %s401_s1, %s288_s22 }
  0x19   : > { %s102_s20 = scalar_lea.vmem [#allocation1], %s285_s19  ;;  %v112_v3 = vand.u32 127, %v111_v1  ;;  %v115_v4 = vshrl.u32 %v111_v1, 7  ;;  %s106_s21 = scalar_lea.vmem [#allocation3], %s285_s19 }
  0x1a   : > { %v109_v2 = vld [vmem:[%s102_s20] sm:$0xf] }
  0x1b   : > { %110 = vst [vmem:[#allocation0] sm:$0xf] %v109_v2  ;;  %vm113_vm0 = vcmp.lt.s32.totalorder %v112_v3, 4  ;;  %vm122_vm1 = vcmp.ge.s32.totalorder %v115_v4, %v112_v3  ;;  %vm117_vm2 = vcmp.eq.s32.totalorder %v115_v4, %v112_v3  ;;  %vm136_vm4 = vcmp.eq.s32.totalorder %v112_v3, 0 }
  0x1c   : > { %vm123_vm3 = vmand %vm122_vm1, %vm113_vm0  ;;  %vm133_vm5 = vcmp.eq.s32.totalorder %v112_v3, %v115_v4  ;;  %v137_v12 = vsel %vm136_vm4, 1.0, %v342_v11  ;;  %vm144_vm6 = vcmp.eq.s32.totalorder %v112_v3, 1  ;;  %vm154_vm7 = vcmp.eq.s32.totalorder %v112_v3, 2 }
  0x1d   : > { %v138_v13 = vsel %vm133_vm5, %v137_v12, 0.0  ;;  %vm164_vm8 = vcmp.eq.s32.totalorder %v112_v3, 3 }
  0x22   : > { %v118_v5 = vld [vmem:[#allocation0] sm:$0xff] }
  0x23   : > { %v119_v6 = vsel %vm117_vm2, %v118_v5, 0.0  ;;  %v124_v7 = vsel %vm123_vm3, %v118_v5, 0.0 }
  0x24   : > { %120 = vadd.xlane.f32.xlu0 %v119_v6 }
  0xb1   : > { %v121_v8 = vpop.xlane.xlu0 %120 }
  0xb2   : > { %316 = vrcp.f32 %v121_v8  ;;  %vm171_vm9 = vweird.f32 %v121_v8 }
  0xbc   : > { %v317_v9 = vpop.eup %316 }
  0xbd   : > { %v126_v10 = vmul.f32 %v317_v9, %v124_v7 }
  0xbf   : > { %127 = vst [vmem:[#allocation4] sm:$0xff] %v126_v10 }
  0xc6   : > { %v140_v14 = vld [vmem:[#allocation4 + $0x1] ss:$0 sm:$0xff]  ;;  %v150_v17 = vld [vmem:[#allocation4 + $0x2] ss:$0 sm:$0xff]  ;;  %v160_v22 = vld [vmem:[#allocation4 + $0x3] ss:$0 sm:$0xff] }
  0xc7   : > { %v141_v15 = vxor.u32 2147483648, %v140_v14  ;;  %v151_v19 = vxor.u32 2147483648, %v150_v17  ;;  %v161_v24 = vxor.u32 2147483648, %v160_v22 }
  0xc9   : > { %v145_v16 = vmul.f32 %v141_v15, %v138_v13 }
  0xcb   : > { %146 = vadd.xlane.f32.xlu0 %v145_v16 }
 0x158   : > { %v147_v18 = vpop.xlane.xlu0 %146 }
 0x159   : > { %v148_v20 = vsel %vm144_vm6, %v147_v18, %v138_v13 }
 0x15a   : > { %v155_v21 = vmul.f32 %v151_v19, %v148_v20 }
 0x15c   : > { %156 = vadd.xlane.f32.xlu1 %v155_v21 }
 0x1e9   : > { %v157_v23 = vpop.xlane.xlu1 %156 }
 0x1ea   : > { %v158_v25 = vsel %vm154_vm7, %v157_v23, %v148_v20 }
 0x1eb   : > { %v165_v26 = vmul.f32 %v161_v24, %v158_v25 }
 0x1ed   : > { %166 = vadd.xlane.f32.xlu1 %v165_v26 }
 0x27a   : > { %v167_v27 = vpop.xlane.xlu1 %166 }
 0x27b   : > { %v168_v28 = vsel %vm164_vm8, %v167_v27, %v158_v25 }
 0x27c   : > { %v170_v29 = vmul.f32 %v317_v9, %v168_v28 }
 0x27e   : > { %v172_v30 = vsel %vm171_vm9, %v168_v28, %v170_v29 }
 0x27f   : > { %173 = vst [vmem:[#allocation2] sm:$0xff] %v172_v30 }
 0x286   : > { %v177_v31 = vld [vmem:[#allocation2] sm:$0xf] }
 0x287   : > { %179 = vst [vmem:[%s106_s21] sm:$0xf] %v177_v31 }
 0x28e   : > { %v204_v32 = vld [vmem:[%s106_s21] sm:$0xf] }
 0x28f   : > { %205 = vst [vmem:[%s188_s25] sm:$0xf] %v204_v32 }
 0x290 PF: > { %s7_s8 = sadd.s32 1, %s340_s8   ;;  %s402_s6 = smov %s336_s7 }
 0x291   : > { %p4_p5 = scmp.ge.s32.totalorder %s7_s8, 5   ;;  %s403_s7 = smov %s405_s10 }
 0x293   :  { %6 = sbr.rel (!%p4_p5) target bundleno = 2 (0x2), region = 113 }

// kernel: custom-call.12
= control target key start
LH: loop header
LB: loop body
LE: loop exit
PB: predicated region body
PF: predicated region fallthrough
CT: control target
= control target key end

     0   :  { %s352_s6 = smov 0   ;;  %s354_s7 = smov 0   ;;  %s399_s0 = inlined_call_operand.vmem [shape: f32[3,1,4,4], index: 0, kind: input, shape index: {}]   ;;  %s400_s1 = inlined_call_operand.vmem [shape: f32[3,1,4,4], index: 1, kind: output, shape index: {}]  }
   0x1   :  { %s356_s8 = smov 0  }
   0x2 LB: > { %s278_s9 = sadd.s32 4294967295, %s339_s8   ;;  %s33_s10 = sadd.s32 1, %s335_s7  ;;  %s339_s8 = sphi %s356_s8, %s7_s8   ;;  %s335_s7 = sphi %s354_s7, %s402_s7   ;;  %s331_s6 = sphi %s352_s6, %s401_s6  }
   0x3   : > { %p35_p0 = scmp.ge.s32.totalorder %s33_s10, 3  ;;  %p280_p1 = scmp.ge.s32.totalorder %s339_s8, 3 }
   0x4   : > { %s49_s11 = sand.u32 (!%p280_p1), 1, %s339_s8   ;;  %s282_s12 = sshll.u32 (!%p280_p1), %s335_s7, 2 }
   0x5   : > { %s404_s10 = smov (%p35_p0, %s33_s10), 0  ;;  %47 = sbr.rel (%p280_p1) target bundleno = 12 (0xc), region = 16 }
   0x6   : > { %s281_s13 = sshll.u32 (!%p280_p1), %s49_s11, 2  ;;  %s56_s16 = scalar_lea.vmem (!%p280_p1), %s399_s0, %s282_s12 }
   0x7   : > { %v72_v0 = vld [vmem:[%s56_s16] sm:$0xf] (!%p280_p1)  ;;  %s51_s17 = scalar_lea.vmem (!%p280_p1), [#allocation1], %s281_s13 }
   0x8   : > { %73 = vst [vmem:[%s51_s17] sm:$0xf] (!%p280_p1), %v72_v0 }
   0xc PF: > { %p283_p2 = scmp.ge.s32.totalorder %s339_s8, 1  ;;  %p89_p3 = scmp.lt.s32.totalorder %s339_s8, 4 }
   0xe   : > { %p90_p4 = pnand %p283_p2, %p89_p3 }
  0x10   : > { %93 = sbr.rel (%p90_p4) target bundleno = 656 (0x290), region = 50 }
  0x17   : > { %s379_s18 = sand.u32 1, %s278_s9   ;;  %v111_v1 = vlaneseq  ;;  %v341_v11 = vmov -1.0   ;;  %s287_s22 = sshll.u32 %s331_s6, 2 }
  0x18   : > { %s284_s19 = sshll.u32 %s379_s18, 2  ;;  %s187_s25 = scalar_lea.vmem %s400_s1, %s287_s22 }
  0x19   : > { %s102_s20 = scalar_lea.vmem [#allocation1], %s284_s19  ;;  %v112_v3 = vand.u32 127, %v111_v1  ;;  %v115_v4 = vshrl.u32 %v111_v1, 7  ;;  %s106_s21 = scalar_lea.vmem [#allocation3], %s284_s19 }
  0x1a   : > { %v109_v2 = vld [vmem:[%s102_s20] sm:$0xf] }
  0x1b   : > { %110 = vst [vmem:[#allocation0] sm:$0xf] %v109_v2  ;;  %vm113_vm0 = vcmp.lt.s32.totalorder %v112_v3, 4  ;;  %vm122_vm1 = vcmp.le.s32.totalorder %v115_v4, %v112_v3  ;;  %vm117_vm2 = vcmp.eq.s32.totalorder %v115_v4, %v112_v3  ;;  %vm136_vm4 = vcmp.eq.s32.totalorder %v112_v3, 3 }
  0x1c   : > { %vm123_vm3 = vmand %vm122_vm1, %vm113_vm0  ;;  %vm133_vm5 = vcmp.eq.s32.totalorder %v112_v3, %v115_v4  ;;  %v137_v12 = vsel %vm136_vm4, 1.0, %v341_v11  ;;  %vm144_vm6 = vcmp.eq.s32.totalorder %v112_v3, 2  ;;  %vm154_vm7 = vcmp.eq.s32.totalorder %v112_v3, 1 }
  0x1d   : > { %v138_v13 = vsel %vm133_vm5, %v137_v12, 0.0  ;;  %vm163_vm8 = vcmp.eq.s32.totalorder %v112_v3, 0 }
  0x22   : > { %v118_v5 = vld [vmem:[#allocation0] sm:$0xff] }
  0x23   : > { %v119_v6 = vsel %vm117_vm2, %v118_v5, 0.0  ;;  %v124_v7 = vsel %vm123_vm3, %v118_v5, 0.0 }
  0x24   : > { %120 = vadd.xlane.f32.xlu0 %v119_v6 }
  0xb1   : > { %v121_v8 = vpop.xlane.xlu0 %120 }
  0xb2   : > { %315 = vrcp.f32 %v121_v8  ;;  %vm170_vm9 = vweird.f32 %v121_v8 }
  0xbc   : > { %v316_v9 = vpop.eup %315 }
  0xbd   : > { %v126_v10 = vmul.f32 %v316_v9, %v124_v7 }
  0xbf   : > { %127 = vst [vmem:[#allocation4] sm:$0xff] %v126_v10 }
  0xc6   : > { %v140_v14 = vld [vmem:[#allocation4 + $0x2] ss:$0 sm:$0xff]  ;;  %v150_v17 = vld [vmem:[#allocation4 + $0x1] ss:$0 sm:$0xff]  ;;  %v159_v22 = vld [vmem:[#allocation4] ss:$0 sm:$0xff] }
  0xc7   : > { %v141_v15 = vxor.u32 2147483648, %v140_v14  ;;  %v151_v19 = vxor.u32 2147483648, %v150_v17  ;;  %v160_v24 = vxor.u32 2147483648, %v159_v22 }
  0xc9   : > { %v145_v16 = vmul.f32 %v141_v15, %v138_v13 }
  0xcb   : > { %146 = vadd.xlane.f32.xlu0 %v145_v16 }
 0x158   : > { %v147_v18 = vpop.xlane.xlu0 %146 }
 0x159   : > { %v148_v20 = vsel %vm144_vm6, %v147_v18, %v138_v13 }
 0x15a   : > { %v155_v21 = vmul.f32 %v151_v19, %v148_v20 }
 0x15c   : > { %156 = vadd.xlane.f32.xlu1 %v155_v21 }
 0x1e9   : > { %v157_v23 = vpop.xlane.xlu1 %156 }
 0x1ea   : > { %v158_v25 = vsel %vm154_vm7, %v157_v23, %v148_v20 }
 0x1eb   : > { %v164_v26 = vmul.f32 %v160_v24, %v158_v25 }
 0x1ed   : > { %165 = vadd.xlane.f32.xlu1 %v164_v26 }
 0x27a   : > { %v166_v27 = vpop.xlane.xlu1 %165 }
 0x27b   : > { %v167_v28 = vsel %vm163_vm8, %v166_v27, %v158_v25 }
 0x27c   : > { %v169_v29 = vmul.f32 %v316_v9, %v167_v28 }
 0x27e   : > { %v171_v30 = vsel %vm170_vm9, %v167_v28, %v169_v29 }
 0x27f   : > { %172 = vst [vmem:[#allocation2] sm:$0xff] %v171_v30 }
 0x286   : > { %v176_v31 = vld [vmem:[#allocation2] sm:$0xf] }
 0x287   : > { %178 = vst [vmem:[%s106_s21] sm:$0xf] %v176_v31 }
 0x28e   : > { %v203_v32 = vld [vmem:[%s106_s21] sm:$0xf] }
 0x28f   : > { %204 = vst [vmem:[%s187_s25] sm:$0xf] %v203_v32 }
 0x290 PF: > { %s7_s8 = sadd.s32 1, %s339_s8   ;;  %s401_s6 = smov %s335_s7 }
 0x291   : > { %p4_p5 = scmp.ge.s32.totalorder %s7_s8, 5   ;;  %s402_s7 = smov %s404_s10 }
 0x293   :  { %6 = sbr.rel (!%p4_p5) target bundleno = 2 (0x2), region = 112 }

// kernel: triangulate_pallas.1
= control target key start
LH: loop header
LB: loop body
LE: loop exit
PB: predicated region body
PF: predicated region fallthrough
CT: control target
= control target key end

     0   :  { %s1562_s0 = inlined_call_operand.vmem [shape: f32[2,8,128], index: 0, kind: input, shape index: {}]   ;;  %s1563_s1 = inlined_call_operand.vmem [shape: f32[3,2,8,128], index: 1, kind: input, shape index: {}]   ;;  %s1564_s2 = inlined_call_operand.vmem [shape: f32[27], index: 2, kind: input, shape index: {}]   ;;  %s1565_s3 = inlined_call_operand.vmem [shape: f32[9], index: 3, kind: input, shape index: {}]   ;;  %s1566_s4 = inlined_call_operand.vmem [shape: f32[9], index: 4, kind: input, shape index: {}]   ;;  %s1567_s5 = inlined_call_operand.vmem [shape: f32[9], index: 5, kind: input, shape index: {}]   ;;  %s1568_s6 = inlined_call_operand.vmem [shape: f32[3], index: 6, kind: input, shape index: {}]   ;;  %s1569_s7 = inlined_call_operand.vmem [shape: f32[8], index: 7, kind: input, shape index: {}]   ;;  %s1570_s8 = inlined_call_operand.<no memory space> [shape: f32[1], index: 8, kind: input, shape index: {}]   ;;  %s1571_s9 = inlined_call_operand.vmem [shape: f32[3,8,128], index: 9, kind: output, shape index: {0}]   ;;  %s1572_s10 = inlined_call_operand.vmem [shape: f32[8,128], index: 10, kind: output, shape index: {1}]   ;;  %s1573_s11 = inlined_call_operand.vmem [shape: f32[8,128], index: 11, kind: output, shape index: {2}]  }
   0x1   :  { %1577 = sst [smem:[#allocation17_spill]] %s1570_s8 }
   0x2   :  { %1578 = sst [smem:[#allocation18_spill]] %s1571_s9 }
   0x3   :  { %1579 = sst [smem:[#allocation19_spill]] %s1572_s10 }
   0x4   :  { %1580 = sst [smem:[#allocation20_spill]] %s1573_s11 }
   0x5   :  { %18 = vsyncpa [#allocation4], 0 }
   0x6   :  { %19 = vsyncpa [#allocation6], 0 }
   0x7   :  { %20 = vsyncpa [#allocation9], 0  ;;  %s42_s19 = sshll.u32 %s1565_s3, 4  ;;  %s43_s19 = int_to_ptr.vmem [resolvable:$true] %s42_s19 }
   0x8   :  { %21 = vsyncpa [#allocation12], 0  ;;  %s62_s22 = sshll.u32 %s1567_s5, 4  ;;  %s765_s23 = scalar_lea.vmem %s43_s19, 16  ;;  %s63_s22 = int_to_ptr.vmem [resolvable:$true] %s62_s22 }
   0x9   :  { %p766_p0 = scmp.ne.s32.totalorder %s43_s19, %s765_s23  ;;  %p770_p1 = scmp.lt.s32.totalorder %s43_s19, %s43_s19 }
   0xa   :  { %p771_p2 = scmp.lt.s32.totalorder %s765_s23, %s765_s23 }
   0xc   :  { %p772_p3 = por %p771_p2, %p770_p1 }
   0xe   :  { %p773_p4 = pnand %p772_p3, %p766_p0 }
  0x10   :  { %776 = shalt.err (!%p773_p4)
}
  0x11   :  { %s845_s24 = smov [#allocation5]   ;;  %s777_s25 = scalar_lea.vmem %s63_s22, 16 }
  0x12   :  { %45 = dma.vmem_to_smem %s43_s19, 16, %s845_s24, [#allocation6]  }
  0x13   :  { %p778_p5 = scmp.ne.s32.totalorder %s63_s22, %s777_s25  ;;  %p782_p6 = scmp.lt.s32.totalorder %s63_s22, %s63_s22 }
  0x14   :  { %p783_p7 = scmp.lt.s32.totalorder %s777_s25, %s777_s25 }
  0x16   :  { %p784_p8 = por %p783_p7, %p782_p6 }
  0x18   :  { %p785_p9 = pnand %p784_p8, %p778_p5 }
  0x1a   :  { %788 = shalt.err (!%p785_p9)
}
  0x1b   :  { %s846_s3 = smov [#allocation8]   ;;  %s32_s27 = sshll.u32 %s1564_s2, 4  ;;  %s33_s27 = int_to_ptr.vmem [resolvable:$true] %s32_s27 }
  0x1c   :  { %65 = dma.vmem_to_smem %s63_s22, 16, %s846_s3, [#allocation9]  }
  0x1d   :  { %s52_s30 = sshll.u32 %s1566_s4, 4  ;;  %s789_s12 = scalar_lea.vmem %s33_s27, 16  ;;  %s53_s30 = int_to_ptr.vmem [resolvable:$true] %s52_s30 }
  0x1e   :  { %p790_p10 = scmp.ne.s32.totalorder %s33_s27, %s789_s12  ;;  %p794_p11 = scmp.lt.s32.totalorder %s33_s27, %s33_s27 }
  0x1f   :  { %p795_p12 = scmp.lt.s32.totalorder %s789_s12, %s789_s12 }
  0x21   :  { %p796_p13 = por %p795_p12, %p794_p11 }
  0x23   :  { %p797_p0 = pnand %p796_p13, %p790_p10 }
  0x25   :  { %800 = shalt.err (!%p797_p0)
}
  0x26   :  { %s847_s13 = smov [#allocation3]   ;;  %s801_s14 = scalar_lea.vmem %s53_s30, 16 }
  0x27   :  { %35 = dma.vmem_to_smem %s33_s27, 16, %s847_s13, [#allocation4]  }
  0x28   :  { %p802_p1 = scmp.ne.s32.totalorder %s53_s30, %s801_s14  ;;  %p806_p2 = scmp.lt.s32.totalorder %s53_s30, %s53_s30 }
  0x29   :  { %p807_p3 = scmp.lt.s32.totalorder %s801_s14, %s801_s14 }
  0x2b   :  { %p808_p4 = por %p807_p3, %p806_p2 }
  0x2d   :  { %p809_p5 = pnand %p808_p4, %p802_p1 }
  0x2f   :  { %812 = shalt.err (!%p809_p5)
}
  0x30   :  { %s848_s2 = smov [#allocation7]   ;;  %s72_s16 = sshll.u32 %s1568_s6, 4  ;;  %s73_s16 = int_to_ptr.vmem [resolvable:$true] %s72_s16 }
  0x31   :  { %55 = dma.vmem_to_smem %s53_s30, 16, %s848_s2, [#allocation6]  }
  0x32   :  { %s82_s19 = sshll.u32 %s1569_s7, 4  ;;  %s813_s20 = scalar_lea.vmem %s73_s16, 16  ;;  %s83_s19 = int_to_ptr.vmem [resolvable:$true] %s82_s19 }
  0x33   :  { %p814_p6 = scmp.ne.s32.totalorder %s73_s16, %s813_s20  ;;  %p818_p7 = scmp.lt.s32.totalorder %s73_s16, %s73_s16 }
  0x34   :  { %p819_p8 = scmp.lt.s32.totalorder %s813_s20, %s813_s20 }
  0x36   :  { %p820_p9 = por %p819_p8, %p818_p7 }
  0x38   :  { %p821_p10 = pnand %p820_p9, %p814_p6 }
  0x3a   :  { %824 = shalt.err (!%p821_p10)
}
  0x3b   :  { %s849_s21 = smov [#allocation10]   ;;  %s825_s22 = scalar_lea.vmem %s83_s19, 16 }
  0x3c   :  { %75 = dma.vmem_to_smem %s73_s16, 16, %s849_s21, [#allocation9]  }
  0x3d   :  { %p826_p11 = scmp.ne.s32.totalorder %s83_s19, %s825_s22  ;;  %p830_p12 = scmp.lt.s32.totalorder %s83_s19, %s83_s19 }
  0x3e   :  { %p831_p13 = scmp.lt.s32.totalorder %s825_s22, %s825_s22 }
  0x40   :  { %p832_p0 = por %p831_p13, %p830_p12 }
  0x42   :  { %p833_p1 = pnand %p832_p0, %p826_p11 }
  0x44   :  { %836 = shalt.err (!%p833_p1)
}
  0x45   :  { %s850_s6 = smov [#allocation11]  }
  0x46   :  { %85 = dma.vmem_to_smem %s83_s19, 16, %s850_s6, [#allocation12]  }
  0x47   :  { %837 = dma.done.wait [#allocation4], 16  }
  0x48   :  { %838 = vsyncadd [#allocation4], 4294967280 }
  0x49   :  { %839 = dma.done.wait [#allocation6], 32  }
  0x4a   :  { %840 = vsyncadd [#allocation6], 4294967264 }
  0x4b   :  { %841 = dma.done.wait [#allocation9], 32  }
  0x4c   :  { %842 = vsyncadd [#allocation9], 4294967264 }
  0x4d   :  { %843 = dma.done.wait [#allocation12], 16  }
  0x4e   :  { %844 = vsyncadd [#allocation12], 4294967280 }
  0x4f   :  { %106 = sfence }
  0x50   :  { %s671_s7 = sld [smem:[#allocation11 + $0x2]]  ;;  %s672_s23 = sld [smem:[#allocation11 + $0x3]]  ;;  %v173_v0 = vld [vmem:[%s1562_s0] sm:$0xff]  ;;  %v729_v1 = vld [vmem:[%s1562_s0 + $0x8] sm:$0xff]  ;;  %v1014_v26 = vld [vmem:[%s1563_s1 + $0x10] sm:$0xff] }
  0x51   :  { %s673_s24 = sld [smem:[#allocation11 + $0x4]]  ;;  %s674_s25 = sld [smem:[#allocation11 + $0x5]]  ;;  %v946_v2 = vld [vmem:[%s1563_s1] sm:$0xff]  ;;  %v951_v3 = vld [vmem:[%s1563_s1 + $0x8] sm:$0xff]  ;;  %v1023_v31 = vld [vmem:[%s1563_s1 + $0x18] sm:$0xff] }
  0x52   :  { %s929_s3 = sld [smem:[#allocation3]]  ;;  %s931_s5 = sld [smem:[#allocation3 + $0x1]] }
  0x53   :  { %s933_s26 = sld [smem:[#allocation3 + $0x3]]  ;;  %s941_s12 = sld [smem:[#allocation3 + $0x4]] }
  0x54   :  { %s957_s15 = sld [smem:[#allocation3 + $0x6]]  ;;  %s959_s0 = sld [smem:[#allocation3 + $0x7]] }
  0x55   :  { %s977_s16 = sld [smem:[#allocation3 + $0x2]]  ;;  %s982_s17 = sld [smem:[#allocation3 + $0x5]] }
  0x56   :  { %v953_v4 = vstv %s671_s7  ;;  %v955_v5 = vstv %s672_s23  ;;  %s984_s18 = sld [smem:[#allocation3 + $0x8]]  ;;  %s992_s19 = sld [smem:[#allocation3 + $0xc]] }
  0x57   :  { %v178_v6 = vsub.f32 %v173_v0, %v953_v4  ;;  %v962_v7 = vstv %s673_s24  ;;  %v182_v8 = vsub.f32 %v729_v1, %v955_v5  ;;  %v965_v9 = vstv %s674_s25  ;;  %s994_s20 = sld [smem:[#allocation3 + $0xd]]  ;;  %s997_s21 = sld [smem:[#allocation3 + $0x9]] }
  0x58   :  { %v195_v10 = vsub.f32 %v946_v2, %v953_v4  ;;  %v197_v11 = vsub.f32 %v951_v3, %v955_v5  ;;  %v199_v16 = vstv %s929_s3  ;;  %v201_v19 = vstv %s931_s5  ;;  %s999_s22 = sld [smem:[#allocation3 + $0xf]]  ;;  %s1001_s6 = sld [smem:[#allocation3 + $0xa]] }
  0x59   :  { %v972_v12 = vmul.f32 %v962_v7, %v178_v6  ;;  %v975_v13 = vmul.f32 %v965_v9, %v182_v8  ;;  %v206_v20 = vstv %s933_s26  ;;  %v208_v21 = vstv %s941_s12  ;;  %s1003_s7 = sld [smem:[#allocation3 + $0x10]]  ;;  %s1033_s28 = sld [smem:[#allocation3 + $0xe]] }
  0x5a   :  { %v196_v14 = vmul.f32 %v195_v10, %v962_v7  ;;  %v198_v15 = vmul.f32 %v197_v11, %v965_v9  ;;  %v213_v29 = vstv %s957_s15  ;;  %v215_v30 = vstv %s959_s0  ;;  %s1035_s29 = sld [smem:[#allocation3 + $0x11]]  ;;  %s1043_s30 = sld [smem:[#allocation3 + $0xb]] }
  0x5b   :  { %v185_v17 = vmul.f32 %v972_v12, %v972_v12  ;;  %v186_v18 = vmul.f32 %v975_v13, %v975_v13  ;;  %v336_v32 = vsub.f32 %v1014_v26, %v953_v4  ;;  %v338_v35 = vsub.f32 %v1023_v31, %v955_v5  ;;  %s1087_s13 = sld [smem:[#allocation11]]  ;;  %s1095_s14 = sld [smem:[#allocation11 + $0x6]] }
  0x5c   :  { %v200_v23 = vmul.f32 %v199_v16, %v196_v14  ;;  %v202_v24 = vmul.f32 %v201_v19, %v198_v15  ;;  %v207_v25 = vmul.f32 %v206_v20, %v196_v14  ;;  %v209_v28 = vmul.f32 %v208_v21, %v198_v15  ;;  %s1097_s2 = sld [smem:[#allocation11 + $0x7]]  ;;  %s1099_s4 = sld [smem:[#allocation5]] }
  0x5d   :  { %v187_v22 = vadd.f32 %v186_v18, %v185_v17  ;;  %v214_v33 = vmul.f32 %v213_v29, %v196_v14  ;;  %v216_v34 = vmul.f32 %v215_v30, %v198_v15  ;;  %v337_v38 = vmul.f32 %v336_v32, %v962_v7  ;;  %s1101_s23 = sld [smem:[#allocation5 + $0x1]]  ;;  %s1105_s24 = sld [smem:[#allocation5 + $0x2]] }
  0x5e   :  { %v203_v36 = vadd.f32 %v202_v24, %v200_v23  ;;  %v210_v37 = vadd.f32 %v209_v28, %v207_v25  ;;  %v347_v39 = vstv %s992_s19  ;;  %v339_v40 = vmul.f32 %v338_v35, %v965_v9  ;;  %s1107_s25 = sld [smem:[#allocation7]]  ;;  %s1109_s27 = sld [smem:[#allocation7 + $0x2]] }
  0x5f   :  { %v188_v27 = vadd.f32 1.0, %v187_v22  ;;  %v349_v41 = vstv %s994_s20  ;;  %v354_v42 = vstv %s999_s22  ;;  %v356_v43 = vstv %s1003_s7  ;;  %s1119_s11 = sld [smem:[#allocation3 + $0x12]]  ;;  %s1121_s9 = sld [smem:[#allocation3 + $0x13]] }
  0x60   :  { %v204_v44 = vstv %s977_s16  ;;  %v211_v45 = vstv %s982_s17  ;;  %v217_v46 = vadd.f32 %v216_v34, %v214_v33  ;;  %v218_v47 = vstv %s984_s18  ;;  %s1135_s10 = sld [smem:[#allocation3 + $0x15]]  ;;  %s1167_s17 = sld [smem:[#allocation7 + $0x1]] }
  0x61   :  { %743 = vrsqrt.f32 %v188_v27  ;;  %v340_v48 = vstv %s997_s21  ;;  %v342_v49 = vstv %s1001_s6  ;;  %v348_v50 = vmul.f32 %v347_v39, %v337_v38  ;;  %s1171_s8 = sld [smem:[#allocation5 + $0x3]]  ;;  %s1195_s18 = sld [smem:[#allocation5 + $0x5]] }
  0x62   :  { %v350_v51 = vmul.f32 %v349_v41, %v339_v40  ;;  %v355_v52 = vmul.f32 %v354_v42, %v337_v38  ;;  %v357_v53 = vmul.f32 %v356_v43, %v339_v40  ;;  %v205_v54 = vadd.f32 %v204_v44, %v203_v36  ;;  %s1203_s3 = sld [smem:[#allocation7 + $0x5]]  ;;  %s1205_s26 = sld [smem:[#allocation3 + $0x19]] }
  0x63   :  { %v212_v55 = vadd.f32 %v211_v45, %v210_v37  ;;  %v341_v56 = vmul.f32 %v340_v48, %v337_v38  ;;  %v343_v57 = vmul.f32 %v342_v49, %v339_v40  ;;  %v219_v58 = vadd.f32 %v218_v47, %v217_v46  ;;  %s1235_s5 = sld [smem:[#allocation3 + $0x1a]]  ;;  %s1306_s12 = sld [smem:[#allocation11 + $0x1]] }
  0x64   :  { %v351_v60 = vadd.f32 %v350_v51, %v348_v50  ;;  %v352_v61 = vstv %s1033_s28  ;;  %v358_v62 = vadd.f32 %v357_v53, %v355_v52  ;;  %v359_v63 = vstv %s1035_s29  ;;  %s1308_s15 = sld [smem:[#allocation7 + $0x3]]  ;;  %s1319_s0 = sld [smem:[#allocation7 + $0x4]] }
  0x65   :  { %v344_v10 = vadd.f32 %v343_v57, %v341_v56  ;;  %v345_v11 = vstv %s1043_s30  ;;  %s1353_s19 = sld [smem:[#allocation5 + $0x6]]  ;;  %s1355_s20 = sld [smem:[#allocation5 + $0x7]] }
  0x66   :  { %v360_v18 = vadd.f32 %v359_v63, %v358_v62  ;;  %s1364_s21 = sld [smem:[#allocation5 + $0x8]]  ;;  %s1391_s6 = sld [smem:[#allocation7 + $0x6]] }
  0x67   :  { %v346_v25 = vadd.f32 %v345_v11, %v344_v10  ;;  %s1380_s22 = sld [smem:[#allocation7 + $0x8]]  ;;  %s1399_s7 = sld [smem:[#allocation7 + $0x7]] }
  0x68   :  { %s1462_s28 = sld [smem:[#allocation8]]  ;;  %s1468_s29 = sld [smem:[#allocation8 + $0x1]] }
  0x69   :  { %s1470_s30 = sld [smem:[#allocation10]]  ;;  %s1490_s16 = sld [smem:[#allocation8 + $0x6]] }
  0x6b   :  { %v1068_v59 = vpop.eup %743 }
  0x6c   :  { %v1074_v0 = vmul.f32 %v1068_v59, %v972_v12  ;;  %v1078_v1 = vmul.f32 %v1068_v59, %v975_v13  ;;  %v221_v6 = vmul.f32 %v1068_v59, %v212_v55  ;;  %v223_v8 = vmul.f32 %v1068_v59, %v205_v54 }
  0x6d   :  { %v1091_v13 = vadd.f32 %v352_v61, %v351_v60  ;;  %v364_v52 = vmul.f32 %v1068_v59, %v346_v25 }
  0x6e   :  { %v220_v14 = vmul.f32 %v219_v58, %v1078_v1  ;;  %v224_v15 = vmul.f32 %v219_v58, %v1074_v0  ;;  %v226_v17 = vmul.f32 %v212_v55, %v1074_v0  ;;  %v227_v12 = vmul.f32 %v205_v54, %v1078_v1 }
  0x6f   :  { %v361_v36 = vmul.f32 %v360_v18, %v1078_v1  ;;  %v362_v37 = vmul.f32 %v1068_v59, %v1091_v13  ;;  %v365_v56 = vmul.f32 %v360_v18, %v1074_v0  ;;  %v367_v60 = vmul.f32 %v1091_v13, %v1074_v0 }
  0x70   :  { %v222_v22 = vsub.f32 %v220_v14, %v221_v6  ;;  %v225_v23 = vsub.f32 %v223_v8, %v224_v15  ;;  %v228_v24 = vsub.f32 %v226_v17, %v227_v12  ;;  %v368_v62 = vmul.f32 %v346_v25, %v1078_v1 }
  0x71   :  { %v238_v6 = vstv %s1099_s4  ;;  %v240_v8 = vstv %s1101_s23  ;;  %v269_v10 = vmul.f32 %v204_v44, %v1074_v0  ;;  %v1143_v14 = vstv %s1097_s2  ;;  %v1160_v44 = vld [vmem:[%s1563_s1 + $0x28] sm:$0xff]  ;;  %s1197_s2 = sld [smem:[#allocation3 + $0x18]]  ;;  %s1212_s23 = sld [smem:[#allocation3 + $0x14]] }
  0x72   :  { %v229_v27 = vmul.f32 %v228_v24, %v212_v55  ;;  %v230_v28 = vmul.f32 %v225_v23, %v219_v58  ;;  %v232_v32 = vmul.f32 %v222_v22, %v219_v58  ;;  %v233_v33 = vmul.f32 %v228_v24, %v205_v54  ;;  %s1488_s4 = sld [smem:[#allocation8 + $0x4]] }
  0x73   :  { %v235_v34 = vmul.f32 %v225_v23, %v205_v54  ;;  %v236_v35 = vmul.f32 %v222_v22, %v212_v55  ;;  %v1126_v54 = vstv %s1087_s13  ;;  %v363_v55 = vsub.f32 %v361_v36, %v362_v37  ;;  %s1145_s13 = sld [smem:[#allocation3 + $0x16]]  ;;  %v1155_v23 = vld [vmem:[%s1563_s1 + $0x20] sm:$0xff]  ;;  %s1180_s1 = sld [smem:[#allocation5 + $0x4]] }
  0x74   :  { %v231_v38 = vsub.f32 %v229_v27, %v230_v28  ;;  %v234_v40 = vsub.f32 %v232_v32, %v233_v33  ;;  %v1130_v58 = vstv %s1095_s14  ;;  %v270_v17 = vmul.f32 %v211_v45, %v1078_v1  ;;  %s1482_s14 = sld [smem:[#allocation8 + $0x3]] }
  0x75   :  { %v1114_v46 = vsub.f32 %v235_v34, %v236_v35  ;;  %v366_v12 = vsub.f32 %v364_v52, %v365_v56  ;;  %v369_v22 = vsub.f32 %v367_v60, %v368_v62  ;;  %v243_v24 = vstv %s1105_s24  ;;  %s1214_s24 = sld [smem:[#allocation3 + $0x17]] }
  0x76   :  { %v246_v50 = vmul.f32 %v231_v38, %v1074_v0  ;;  %v247_v51 = vmul.f32 %v234_v40, %v1078_v1  ;;  %v1164_v27 = vstv %s1109_s27  ;;  %v281_v28 = vstv %s1107_s25  ;;  %s1474_s25 = sld [smem:[#allocation10 + $0x1]]  ;;  %s1476_s27 = sld [smem:[#allocation10 + $0x2]] }
  0x77   :  { %v249_v53 = vmul.f32 %v1068_v59, %v1114_v46  ;;  %v373_v32 = vmul.f32 %v363_v55, %v360_v18  ;;  %v370_v45 = vmul.f32 %v369_v22, %v1091_v13  ;;  %v371_v33 = vmul.f32 %v366_v12, %v360_v18 }
  0x78   :  { %v248_v57 = vadd.f32 %v247_v51, %v246_v50  ;;  %v374_v34 = vmul.f32 %v369_v22, %v346_v25  ;;  %v272_v35 = vmul.f32 %v1068_v59, %v218_v47  ;;  %v376_v36 = vmul.f32 %v366_v12, %v346_v25 }
  0x79   :  { %v472_v37 = vsub.f32 %v1155_v23, %v953_v4  ;;  %v474_v50 = vsub.f32 %v1160_v44, %v955_v5  ;;  %v271_v51 = vadd.f32 %v270_v17, %v269_v10  ;;  %v1182_v52 = vsub.f32 %v370_v45, %v371_v33 }
  0x7a   :  { %v1147_v15 = vadd.f32 %v249_v53, %v248_v57  ;;  %v1184_v53 = vsub.f32 %v373_v32, %v374_v34  ;;  %v377_v18 = vmul.f32 %v363_v55, %v1091_v13  ;;  %v259_v47 = vmul.f32 %v199_v16, %v1074_v0 }
  0x7b   :  { %v260_v25 = vmul.f32 %v206_v20, %v1078_v1  ;;  %v476_v56 = vstv %s1119_s11  ;;  %v1576_v57 = vstv %s1121_s9  ;;  %v239_v60 = vmul.f32 %v238_v6, %v231_v38  ;;  %s1583_s11 = sld [smem:[#allocation17_spill]] }
  0x7c   :  { %745 = vrcp.f32 %v1147_v15  ;;  %v241_v62 = vmul.f32 %v240_v8, %v234_v40  ;;  %v1199_v10 = vsub.f32 %v376_v36, %v377_v18  ;;  %v387_v16 = vmul.f32 %v1182_v52, %v1074_v0 }
  0x7d   :  { %v388_v20 = vmul.f32 %v1184_v53, %v1078_v1  ;;  %v473_v13 = vmul.f32 %v472_v37, %v962_v7  ;;  %v475_v38 = vmul.f32 %v474_v50, %v965_v9  ;;  %v483_v40 = vstv %s1135_s10 }
  0x7e   :  { %v262_v55 = vmul.f32 %v1068_v59, %v213_v29  ;;  %v273_v6 = vadd.f32 %v272_v35, %v271_v51  ;;  %v390_v8 = vmul.f32 %v1068_v59, %v1199_v10  ;;  %v1575_v7 = vstv %s1145_s13 }
  0x7f   :  { %v261_v17 = vadd.f32 %v260_v25, %v259_v47  ;;  %v264_v9 = vmul.f32 %v201_v19, %v1074_v0  ;;  %v265_v12 = vmul.f32 %v208_v21, %v1078_v1  ;;  %v389_v22 = vadd.f32 %v388_v20, %v387_v16 }
  0x80   :  { %v242_v32 = vadd.f32 %v241_v62, %v239_v60  ;;  %v244_v29 = vmul.f32 %v243_v24, %v1114_v46  ;;  %v276_v45 = vmul.f32 10.0, %v273_v6  ;;  %v288_v33 = vstv %s1167_s17  ;;  %s1496_s17 = sld [smem:[#allocation8 + $0x5]] }
  0x81   :  { %v379_v34 = vstv %s1171_s8  ;;  %v391_v35 = vadd.f32 %v390_v8, %v389_v22  ;;  %v477_v36 = vmul.f32 %v476_v56, %v473_v13  ;;  %v479_v37 = vmul.f32 %v1576_v57, %v475_v38  ;;  %s1498_s8 = sld [smem:[#allocation8 + $0x7]] }
  0x82   :  { %v267_v19 = vmul.f32 %v1068_v59, %v215_v30  ;;  %v381_v21 = vstv %s1180_s1  ;;  %v484_v46 = vmul.f32 %v483_v40, %v473_v13  ;;  %v486_v24 = vmul.f32 %v1575_v7, %v475_v38  ;;  %s1508_s1 = sld [smem:[#allocation8 + $0x8]] }
  0x83   :  { %v1246_v18 = vadd.f32 %v262_v55, %v261_v17  ;;  %v266_v47 = vadd.f32 %v265_v12, %v264_v9  ;;  %747 = vrcp.f32 %v391_v35  ;;  %v245_v25 = vadd.f32 %v244_v29, %v242_v32 }
  0x84   :  { %v275_v30 = vsub.f32 %v273_v6, %v1164_v27  ;;  %v277_v60 = vsub.f32 %v276_v45, %v1164_v27  ;;  %v490_v62 = vstv %s1197_s2  ;;  %v480_v20 = vadd.f32 %v479_v37, %v477_v36 }
  0x85   :  { %v487_v8 = vadd.f32 %v486_v24, %v484_v46  ;;  %v492_v22 = vstv %s1205_s26  ;;  %v1254_v55 = vstv %s1203_s3  ;;  %v481_v17 = vstv %s1212_s23  ;;  %s1590_s3 = sld [smem:[#allocation19_spill]] }
  0x86   :  { %v746_v50 = vpop.eup %745  ;;  %v488_v9 = vstv %s1214_s24  ;;  %v1260_v32 = vmul.f32 %v1164_v27, %v1246_v18  ;;  %v1264_v29 = vmul.f32 %v281_v28, %v273_v6  ;;  %v491_v45 = vmul.f32 %v490_v62, %v473_v13  ;;  %s1591_s24 = sld [smem:[#allocation18_spill]] }
  0x87   :  { %v252_v51 = vmul.f32 %v746_v50, %v1147_v15  ;;  %v384_v15 = vstv %s1195_s18  ;;  %v278_v36 = vmul.f32 %v277_v60, %v275_v30  ;;  %v380_v37 = vmul.f32 %v379_v34, %v1182_v52 }
  0x88   :  { %v382_v46 = vmul.f32 %v381_v21, %v1184_v53  ;;  %v493_v24 = vmul.f32 %v492_v22, %v475_v38  ;;  %v489_v7 = vadd.f32 %v488_v9, %v487_v8  ;;  %v410_v57 = vmul.f32 %v345_v11, %v1074_v0 }
  0x89   :  { %v253_v16 = vsub.f32 2.0, %v252_v51  ;;  %v411_v13 = vmul.f32 %v352_v61, %v1078_v1  ;;  %v495_v34 = vstv %s1235_s5  ;;  %v283_v53 = vsub.f32 %v1260_v32, %v1264_v29 }
  0x8a   :  { %v494_v52 = vadd.f32 %v493_v24, %v491_v45  ;;  %749 = vrcp.f32 %v278_v36  ;;  %v385_v11 = vmul.f32 %v384_v15, %v1199_v10  ;;  %v400_v61 = vmul.f32 %v340_v48, %v1074_v0 }
  0x8b   :  { %v254_v12 = vmul.f32 %v746_v50, %v253_v16  ;;  %v268_v50 = vadd.f32 %v267_v19, %v266_v47  ;;  %v482_v16 = vadd.f32 %v481_v17, %v480_v20  ;;  %v289_v19 = vmul.f32 %v288_v33, %v273_v6 }
  0x8c   :  { %v383_v47 = vadd.f32 %v382_v46, %v380_v37  ;;  %v496_v60 = vadd.f32 %v495_v34, %v494_v52  ;;  %v498_v20 = vmul.f32 %v1068_v59, %v489_v7  ;;  %v413_v10 = vmul.f32 %v1068_v59, %v359_v63 }
  0x8d   :  { %v1272_v51 = vmul.f32 %v254_v12, %v245_v25  ;;  %v1288_v38 = vmul.f32 %v1164_v27, %v268_v50  ;;  %v748_v25 = vpop.eup %747  ;;  %v500_v8 = vmul.f32 %v1068_v59, %v482_v16  ;;  %v412_v12 = vadd.f32 %v411_v13, %v410_v57 }
  0x8e   :  { %v503_v15 = vmul.f32 %v489_v7, %v1074_v0  ;;  %v497_v48 = vmul.f32 %v496_v60, %v1078_v1  ;;  %v504_v32 = vmul.f32 %v482_v16, %v1078_v1  ;;  %v386_v29 = vadd.f32 %v385_v11, %v383_v47 }
  0x8f   :  { %v297_v21 = vmul.f32 %v273_v6, %v1272_v51  ;;  %v393_v6 = vmul.f32 %v748_v25, %v391_v35  ;;  %v401_v57 = vmul.f32 %v347_v39, %v1078_v1  ;;  %v405_v63 = vmul.f32 %v342_v49, %v1074_v0 }
  0x90   :  { %v406_v35 = vmul.f32 %v349_v41, %v1078_v1  ;;  %v499_v36 = vsub.f32 %v497_v48, %v498_v20  ;;  %v505_v46 = vsub.f32 %v503_v15, %v504_v32  ;;  %v300_v24 = vmul.f32 %v1246_v18, %v1272_v51 }
  0x91   :  { %v298_v30 = vsub.f32 %v297_v21, %v1164_v27  ;;  %v501_v27 = vmul.f32 %v496_v60, %v1074_v0  ;;  %v394_v45 = vsub.f32 2.0, %v393_v6  ;;  %v306_v13 = vmul.f32 %v268_v50, %v1272_v51 }
  0x92   :  { %v414_v52 = vadd.f32 %v413_v10, %v412_v12  ;;  %v506_v49 = vmul.f32 %v505_v46, %v489_v7  ;;  %v509_v47 = vmul.f32 %v499_v36, %v496_v60  ;;  %v510_v41 = vmul.f32 %v505_v46, %v482_v16 }
  0x93   :  { %751 = vrcp.f32 %v298_v30  ;;  %v502_v37 = vsub.f32 %v500_v8, %v501_v27  ;;  %v395_v39 = vmul.f32 %v748_v25, %v394_v45  ;;  %v513_v8 = vmul.f32 %v499_v36, %v489_v7 }
  0x94   :  { %v417_v30 = vmul.f32 10.0, %v414_v52  ;;  %v290_v6 = vsub.f32 %v1288_v38, %v289_v19  ;;  %v402_v18 = vadd.f32 %v401_v57, %v400_v61  ;;  %v403_v50 = vmul.f32 %v1068_v59, %v354_v42  ;;  %v750_v12 = vpop.eup %749 }
  0x95   :  { %v507_v21 = vmul.f32 %v502_v37, %v496_v60  ;;  %v1327_v11 = vmul.f32 %v395_v39, %v386_v29  ;;  %v512_v20 = vmul.f32 %v502_v37, %v482_v16  ;;  %v408_v25 = vmul.f32 %v1068_v59, %v356_v43 }
  0x96   :  { %v301_v10 = vsub.f32 %v300_v24, %v281_v28  ;;  %v307_v60 = vsub.f32 %v306_v13, %v288_v33  ;;  %v407_v15 = vadd.f32 %v406_v35, %v405_v63  ;;  %v1342_v16 = vstv %s1306_s12 }
  0x97   :  { %v436_v48 = vmul.f32 %v414_v52, %v1327_v11  ;;  %v422_v7 = vstv %s1308_s15  ;;  %v508_v38 = vsub.f32 %v506_v49, %v507_v21  ;;  %v511_v19 = vsub.f32 %v509_v47, %v510_v41 }
  0x98   :  { %v416_v61 = vsub.f32 %v414_v52, %v1254_v55  ;;  %v418_v42 = vsub.f32 %v417_v30, %v1254_v55  ;;  %v1348_v27 = vsub.f32 %v512_v20, %v513_v8  ;;  %v285_v32 = vmul.f32 %v1130_v58, %v283_v53 }
  0x99   :  { %v437_v43 = vsub.f32 %v436_v48, %v1254_v55  ;;  %v292_v33 = vmul.f32 %v1143_v14, %v290_v6  ;;  %v404_v29 = vadd.f32 %v403_v50, %v402_v18  ;;  %v428_v45 = vstv %s1319_s0 }
  0x9a   :  { %v409_v35 = vadd.f32 %v408_v25, %v407_v15  ;;  %v423_v37 = vmul.f32 %v422_v7, %v414_v52  ;;  %v523_v46 = vmul.f32 %v508_v38, %v1074_v0  ;;  %v524_v53 = vmul.f32 %v511_v19, %v1078_v1 }
  0x9b   :  { %753 = vrcp.f32 %v437_v43  ;;  %v421_v36 = vmul.f32 %v1254_v55, %v404_v29  ;;  %v419_v39 = vmul.f32 %v418_v42, %v416_v61  ;;  %v526_v49 = vmul.f32 %v1068_v59, %v1348_v27 }
  0x9c   :  { %v286_v21 = vmul.f32 %v750_v12, %v285_v32  ;;  %v427_v47 = vmul.f32 %v1254_v55, %v409_v35  ;;  %v525_v41 = vadd.f32 %v524_v53, %v523_v46  ;;  %v546_v30 = vmul.f32 %v481_v17, %v1074_v0 }
  0x9d   :  { %v752_v28 = vpop.eup %751  ;;  %v293_v20 = vmul.f32 %v750_v12, %v292_v33  ;;  %v439_v8 = vmul.f32 %v404_v29, %v1327_v11  ;;  %v444_v6 = vmul.f32 %v409_v35, %v1327_v11  ;;  %v547_v18 = vmul.f32 %v488_v9, %v1078_v1 }
  0x9e   :  { %v302_v57 = vmul.f32 %v752_v28, %v301_v10  ;;  %v308_v63 = vmul.f32 %v752_v28, %v307_v60  ;;  %v527_v10 = vadd.f32 %v526_v49, %v525_v41  ;;  %v549_v55 = vmul.f32 %v1068_v59, %v495_v34 }
  0x9f   :  { %755 = vrcp.f32 %v419_v39  ;;  %v424_v17 = vsub.f32 %v421_v36, %v423_v37  ;;  %v429_v12 = vmul.f32 %v428_v45, %v414_v52  ;;  %v548_v60 = vadd.f32 %v547_v18, %v546_v30 }
  0xa0   :  { %v304_v24 = vmul.f32 %v1126_v54, %v302_v57  ;;  %v310_v13 = vmul.f32 %v1342_v16, %v308_v63  ;;  %757 = vrcp.f32 %v527_v10  ;;  %v440_v15 = vsub.f32 %v439_v8, %v422_v7 }
  0xa1   :  { %v445_v48 = vsub.f32 %v444_v6, %v428_v45  ;;  %v515_v61 = vstv %s1353_s19  ;;  %v517_v9 = vstv %s1355_s20  ;;  %v1386_v28 = vadd.f32 %v549_v55, %v548_v60 }
  0xa2   :  { %v305_v50 = vadd.f32 %v304_v24, %v953_v4  ;;  %v311_v25 = vadd.f32 %v310_v13, %v955_v5  ;;  %v294_v32 = vmul.f32 %v286_v21, %v286_v21  ;;  %v295_v33 = vmul.f32 %v293_v20, %v293_v20 }
  0xa3   :  { %v425_v52 = vmul.f32 %v424_v17, %v1130_v58  ;;  %v430_v29 = vsub.f32 %v427_v47, %v429_v12  ;;  %v516_v7 = vmul.f32 %v515_v61, %v508_v38  ;;  %v518_v45 = vmul.f32 %v517_v9, %v511_v19 }
  0xa4   :  { %v312_v42 = vsub.f32 %v305_v50, %v946_v2  ;;  %v313_v43 = vsub.f32 %v311_v25, %v951_v3  ;;  %v520_v57 = vstv %s1364_s21  ;;  %v553_v63 = vmul.f32 10.0, %v1386_v28  ;;  %s1592_s21 = sld [smem:[#allocation20_spill]] }
  0xa5   :  { %v754_v34 = vpop.eup %753  ;;  %v536_v37 = vmul.f32 %v476_v56, %v1074_v0  ;;  %v537_v46 = vmul.f32 %v483_v40, %v1078_v1  ;;  %v1581_v19 = vstv %s1121_s9  ;;  %v1582_v13 = vstv %s1145_s13  ;;  %s1480_s13 = sld [smem:[#allocation8 + $0x2]] }
  0xa6   :  { %v441_v35 = vmul.f32 %v754_v34, %v440_v15  ;;  %v446_v36 = vmul.f32 %v754_v34, %v445_v48  ;;  %v314_v53 = vmul.f32 %v312_v42, %v312_v42  ;;  %v315_v38 = vmul.f32 %v313_v43, %v313_v43 }
  0xa7   :  { %v541_v24 = vmul.f32 %v1581_v19, %v1074_v0  ;;  %v542_v39 = vmul.f32 %v1582_v13, %v1078_v1  ;;  %v1409_v49 = vmul.f32 %v1068_v59, %v1272_v51  ;;  %v296_v21 = vadd.f32 %v295_v33, %v294_v32 }
  0xa8   :  { %v431_v56 = vmul.f32 %v430_v29, %v1143_v14  ;;  %v551_v40 = vstv %s1380_s22  ;;  %v519_v47 = vadd.f32 %v518_v45, %v516_v7  ;;  %v521_v41 = vmul.f32 %v520_v57, %v1348_v27 }
  0xa9   :  { %v552_v30 = vsub.f32 %v1386_v28, %v551_v40  ;;  %v554_v20 = vsub.f32 %v553_v63, %v551_v40  ;;  %v756_v8 = vpop.eup %755  ;;  %v1418_v6 = vstv %s1583_s11  ;;  %v442_v18 = vmul.f32 %v441_v35, %v1126_v54 }
  0xaa   :  { %v447_v50 = vmul.f32 %v446_v36, %v1342_v16  ;;  %v539_v25 = vmul.f32 %v1068_v59, %v490_v62  ;;  %v758_v55 = vpop.eup %757  ;;  %v316_v17 = vadd.f32 %v315_v38, %v314_v53  ;;  %v538_v27 = vadd.f32 %v537_v46, %v536_v37 }
  0xab   :  { %v543_v12 = vadd.f32 %v542_v39, %v541_v24  ;;  %v544_v60 = vmul.f32 %v1068_v59, %v492_v22  ;;  %vm317_vm0 = vcmp.gt.f32.partialorder %v1409_v49, 1e-06  ;;  %vm318_vm1 = vcmp.gt.f32.partialorder %v296_v21, 0.0 }
  0xac   :  { %v323_v15 = vmin.f32 %v946_v2, %v951_v3  ;;  %v529_v48 = vmul.f32 %v758_v55, %v527_v10  ;;  %v426_v61 = vmul.f32 %v756_v8, %v425_v52  ;;  %v432_v9 = vmul.f32 %v756_v8, %v431_v56  ;;  %vm319_vm2 = vmand %vm317_vm0, %vm318_vm1 }
  0xad   :  { %v522_v42 = vadd.f32 %v521_v41, %v519_v47  ;;  %v555_v62 = vmul.f32 %v554_v20, %v552_v30  ;;  %v443_v43 = vadd.f32 %v442_v18, %v953_v4  ;;  %v448_v34 = vadd.f32 %v447_v50, %v955_v5 }
  0xae   :  { %v530_v32 = vsub.f32 2.0, %v529_v48  ;;  %v558_v33 = vstv %s1391_s6  ;;  %vm321_vm3 = vcmp.lt.f32.partialorder %v316_v17, %v1418_v6  ;;  %v540_v22 = vadd.f32 %v539_v25, %v538_v27 }
  0xaf   :  { %v545_v29 = vadd.f32 %v544_v60, %v543_v12  ;;  %v564_v7 = vstv %s1399_s7  ;;  %vm324_vm4 = vcmp.gt.f32.partialorder %v323_v15, 0.0  ;;  %759 = vrcp.f32 %v555_v62  ;;  %vm322_vm5 = vmand %vm319_vm2, %vm321_vm3 }
  0xb0   :  { %v531_v45 = vmul.f32 %v758_v55, %v530_v32  ;;  %v557_v2 = vmul.f32 %v551_v40, %v540_v22  ;;  %v559_v3 = vmul.f32 %v558_v33, %v1386_v28  ;;  %v449_v52 = vsub.f32 %v443_v43, %v1014_v26  ;;  %vm1444_vm6 = vmand %vm322_vm5, %vm324_vm4 }
  0xb1   :  { %v563_v10 = vmul.f32 %v551_v40, %v545_v29  ;;  %v450_v57 = vsub.f32 %v448_v34, %v1023_v31  ;;  %v565_v35 = vmul.f32 %v564_v7, %v1386_v28  ;;  %v433_v36 = vmul.f32 %v426_v61, %v426_v61 }
  0xb2   :  { %v1439_v63 = vmul.f32 %v531_v45, %v522_v42  ;;  %v434_v37 = vmul.f32 %v432_v9, %v432_v9  ;;  %v560_v38 = vsub.f32 %v557_v2, %v559_v3  ;;  %v451_v19 = vmul.f32 %v449_v52, %v449_v52 }
  0xb3   :  { %v452_v24 = vmul.f32 %v450_v57, %v450_v57  ;;  %v566_v13 = vsub.f32 %v563_v10, %v565_v35  ;;  %v1450_v56 = vmul.f32 %v1068_v59, %v1327_v11  ;;  %v329_v41 = vsel %vm1444_vm6, %v296_v21, 0.0 }
  0xb4   :  { %v572_v46 = vmul.f32 %v1386_v28, %v1439_v63  ;;  %v435_v47 = vadd.f32 %v434_v37, %v433_v36  ;;  %v561_v28 = vmul.f32 %v560_v38, %v1130_v58  ;;  %v580_v18 = vmul.f32 %v545_v29, %v1439_v63 }
  0xb5   :  { %v453_v30 = vadd.f32 %v452_v24, %v451_v19  ;;  %v567_v20 = vmul.f32 %v566_v13, %v1143_v14  ;;  %vm454_vm7 = vcmp.gt.f32.partialorder %v1450_v56, 1e-06  ;;  %v459_v50 = vmin.f32 %v1014_v26, %v1023_v31 }
  0xb6   :  { %v573_v39 = vsub.f32 %v572_v46, %v551_v40  ;;  %vm455_vm8 = vcmp.gt.f32.partialorder %v435_v47, %v329_v41  ;;  %v575_v40 = vmul.f32 %v540_v22, %v1439_v63  ;;  %v581_v58 = vsub.f32 %v580_v18, %v564_v7 }
  0xb7   :  { %vm456_vm9 = vmand %vm454_vm7, %vm455_vm8  ;;  %vm457_vm10 = vcmp.lt.f32.partialorder %v453_v30, %v1418_v6  ;;  %vm460_vm12 = vcmp.gt.f32.partialorder %v459_v50, 0.0  ;;  %v535_v48 = vmul.f32 %v1068_v59, %v1439_v63  ;;  %v257_v59 = vmul.f32 %v1272_v51, %v1078_v1 }
  0xb8   :  { %761 = vrcp.f32 %v573_v39  ;;  %v576_v55 = vsub.f32 %v575_v40, %v558_v33  ;;  %vm458_vm11 = vmand %vm456_vm9, %vm457_vm10  ;;  %v397_v43 = vmul.f32 %v1327_v11, %v1074_v0  ;;  %v602_v29 = vstv %s1470_s30 }
  0xb9   :  { %v760_v8 = vpop.eup %759  ;;  %vm1464_vm13 = vmand %vm458_vm11, %vm460_vm12  ;;  %vm590_vm14 = vcmp.gt.f32.partialorder %v535_v48, 1e-06  ;;  %v533_v7 = vmul.f32 %v1439_v63, %v1074_v0  ;;  %v534_v45 = vmul.f32 %v1439_v63, %v1078_v1  ;;  %v606_v2 = vstv %s1476_s27 }
  0xba   :  { %v562_v21 = vmul.f32 %v760_v8, %v561_v28  ;;  %v568_v25 = vmul.f32 %v760_v8, %v567_v20  ;;  %v465_v9 = vsel %vm1464_vm13, %v435_v47, %v329_v41  ;;  %v610_v57 = vstv %s1482_s14 }
  0xbb   :  { %v613_v35 = vstv %s1490_s16  ;;  %v619_v63 = vstv %s1488_s4  ;;  %v622_v36 = vstv %s1498_s8  ;;  %v627_v37 = vstv %s1480_s13 }
  0xbc   :  { %v569_v17 = vmul.f32 %v562_v21, %v562_v21  ;;  %v570_v27 = vmul.f32 %v568_v25, %v568_v25  ;;  %v629_v46 = vstv %s1496_s17 }
  0xbe   :  { %v571_v61 = vadd.f32 %v570_v27, %v569_v17 }
  0xc0   :  { %vm591_vm15 = vcmp.gt.f32.partialorder %v571_v61, %v465_v9 }
  0xc1   :  { %vm592_vm0 = vmand %vm590_vm14, %vm591_vm15 }
  0xc2   :  { %v762_v14 = vpop.eup %761 }
  0xc3   :  { %v577_v12 = vmul.f32 %v762_v14, %v576_v55  ;;  %v582_v60 = vmul.f32 %v762_v14, %v581_v58 }
  0xc5   :  { %v578_v26 = vmul.f32 %v577_v12, %v1126_v54  ;;  %v583_v31 = vmul.f32 %v582_v60, %v1342_v16  ;;  %v256_v16 = vmul.f32 %v1272_v51, %v1074_v0  ;;  %v398_v51 = vmul.f32 %v1327_v11, %v1078_v1 }
  0xc6   :  { %v608_v0 = vstv %s1462_s28  ;;  %v617_v1 = vstv %s1468_s29 }
  0xc7   :  { %v579_v42 = vadd.f32 %v578_v26, %v953_v4  ;;  %v584_v54 = vadd.f32 %v583_v31, %v955_v5  ;;  %v595_v5 = vmin.f32 %v1155_v23, %v1160_v44  ;;  %v326_v33 = vsel %vm1444_vm6, %v256_v16, 0.0 }
  0xc8   :  { %v462_v3 = vsel %vm1464_vm13, %v397_v43, %v326_v33 }
  0xc9   :  { %v585_v62 = vsub.f32 %v579_v42, %v1155_v23  ;;  %v586_v4 = vsub.f32 %v584_v54, %v1160_v44  ;;  %v327_v23 = vsel %vm1444_vm6, %v257_v59, 0.0  ;;  %v328_v44 = vsel %vm1444_vm6, %v1409_v49, 0.0 }
  0xca   :  { %vm1517_vm1 = vcmp.gt.f32.partialorder %v595_v5, 0.0  ;;  %v604_v49 = vstv %s1474_s25  ;;  %v463_v10 = vsel %vm1464_vm13, %v398_v51, %v327_v23  ;;  %v464_v52 = vsel %vm1464_vm13, %v1450_v56, %v328_v44 }
  0xcb   :  { %v587_v34 = vmul.f32 %v585_v62, %v585_v62  ;;  %v588_v32 = vmul.f32 %v586_v4, %v586_v4  ;;  %v632_v56 = vstv %s1508_s1 }
  0xcd   :  { %v589_v22 = vadd.f32 %v588_v32, %v587_v34 }
  0xcf   :  { %vm593_vm2 = vcmp.lt.f32.partialorder %v589_v22, %v1418_v6 }
  0xd0   :  { %vm594_vm3 = vmand %vm592_vm0, %vm593_vm2 }
  0xd1   :  { %vm597_vm4 = vmand %vm594_vm3, %vm1517_vm1 }
  0xd2   :  { %v598_v53 = vsel %vm597_vm4, %v533_v7, %v462_v3  ;;  %v599_v38 = vsel %vm597_vm4, %v534_v45, %v463_v10  ;;  %v600_v19 = vsel %vm597_vm4, %v535_v48, %v464_v52  ;;  %v601_v24 = vsel %vm597_vm4, %v571_v61, %v465_v9 }
  0xd3   :  { %v603_v13 = vsub.f32 %v598_v53, %v602_v29  ;;  %v605_v39 = vsub.f32 %v599_v38, %v604_v49  ;;  %v607_v6 = vsub.f32 %v600_v19, %v606_v2  ;;  %637 = vst [vmem:[%s1590_s3] sm:$0xff] %v600_v19  ;;  %763 = vrsqrt.f32 %v601_v24 }
  0xd4   :  { %vm640_vm5 = vcmp.eq.f32.partialorder %v601_v24, inf  ;;  %v643_v12 = vand.u32 2147483648, %v601_v24  ;;  %vm642_vm6 = vcmp.eq.f32.partialorder %v601_v24, 0.0 }
  0xd5   :  { %v609_v47 = vmul.f32 %v608_v0, %v603_v13  ;;  %v611_v41 = vmul.f32 %v610_v57, %v605_v39  ;;  %v614_v30 = vmul.f32 %v613_v35, %v607_v6  ;;  %v618_v28 = vmul.f32 %v617_v1, %v603_v13 }
  0xd6   :  { %v620_v20 = vmul.f32 %v619_v63, %v605_v39  ;;  %v623_v8 = vmul.f32 %v622_v36, %v607_v6  ;;  %v628_v40 = vmul.f32 %v627_v37, %v603_v13  ;;  %v630_v18 = vmul.f32 %v629_v46, %v605_v39 }
  0xd7   :  { %v612_v50 = vadd.f32 %v611_v41, %v609_v47  ;;  %v633_v21 = vmul.f32 %v632_v56, %v607_v6 }
  0xd8   :  { %v621_v25 = vadd.f32 %v620_v20, %v618_v28  ;;  %v631_v55 = vadd.f32 %v630_v18, %v628_v40 }
  0xd9   :  { %v615_v58 = vadd.f32 %v614_v30, %v612_v50 }
  0xda   :  { %v624_v14 = vadd.f32 %v623_v8, %v621_v25  ;;  %v634_v17 = vadd.f32 %v633_v21, %v631_v55 }
  0xdb   :  { %616 = vst [vmem:[%s1591_s24] sm:$0xff] %v615_v58 }
  0xdc   :  { %735 = vst [vmem:[%s1591_s24 + $0x8] sm:$0xff] %v624_v14  ;;  %736 = vst [vmem:[%s1591_s24 + $0x10] sm:$0xff] %v634_v17 }
  0xdd   :  { %v764_v27 = vpop.eup %763 }
  0xde   :  { %v639_v60 = vmul.f32 %v764_v27, %v601_v24 }
  0xe0   :  { %v641_v15 = vsel %vm640_vm5, %v601_v24, %v639_v60 }
  0xe1   :  { %v644_v26 = vsel %vm642_vm6, %v643_v12, %v641_v15 }
  0xe2   :  { %645 = vst [vmem:[%s1592_s21] sm:$0xff] %v644_v26 }
  0xe3   :  { %658 = vsyncpa [#allocation4], 1 }
  0xe4   :  { %659 = vsyncpa [#allocation6], 1 }
  0xe5   :  { %660 = vsyncpa [#allocation9], 1 }
  0xe6   :  { %661 = vsyncpa [#allocation12], 1 }

</bundles_post_ra>
